<compile_context>
chip_gen: v7x
topology: tpu7x:2x2x1
jax: 0.10.0
libtpu: 0.0.40
codegen_flags: <defaults>
</compile_context>

<pallas_src>
import jax
import jax.numpy as jnp
from jax.experimental import pallas as pl
from jax.experimental.pallas import tpu as pltpu


def _round_up(a, b):
    return ((a + b - 1) // b) * b


def _vmem_capacity_bytes():
    """Physical per-core VMEM; conservative fallback if the query is unavailable."""
    try:
        cap = getattr(pltpu.get_tpu_info(), "vmem_capacity_bytes", None)
        if cap:
            return int(cap)
    except Exception:
        pass
    return 64 << 20  # v7x per-TensorCore VMEM (smallest of current generations)


def _vmem_footprint(tm, tk, tn, H):
    """Approximate VMEM working set: double-buffered pipeline blocks + in-body f32
    intermediate."""
    dbl = 2
    return (dbl * tm * H * 2        # x token tile (bf16)
            + dbl * H * tk * 2      # w1 column chunk (bf16)
            + dbl * tk * tn * 2     # w2 row chunk (bf16)
            + dbl * tm * tn * 4     # resident output tile / accumulator (f32)
            + dbl * 8 * tk * 4      # b1 chunk (f32, sublane padded)
            + dbl * 8 * tn * 4      # b2 chunk (f32, sublane padded)
            + tm * tk * 4)          # ReLU intermediate chunk (f32)


def _ffn_kernel(x_ref, w1_ref, b1_ref, w2_ref, b2_ref, o_ref):
    # Grid = (token tiles i, output-H tiles j, 4H reduction chunks k).
    #   x_ref:  (tm, H)   bf16   token tile              (constant along j, k)
    #   w1_ref: (H, tk)   bf16   w1 column chunk         (constant along i, j)
    #   b1_ref: (1, tk)   f32
    #   w2_ref: (tk, tn)  bf16   w2 chunk                (constant along i)
    #   b2_ref: (1, tn)   f32
    #   o_ref:  (tm, tn)  f32    output tile, resident across k -> used directly
    #                            as the accumulator (no scratch needed).
    k = pl.program_id(2)

    @pl.when(k == 0)
    def _():
        # Start the accumulation from the (broadcast) second bias; this also
        # removes the epilogue bias add.
        o_ref[...] = jnp.broadcast_to(b2_ref[...], o_ref.shape).astype(o_ref.dtype)

    # First matmul chunk on the MXU (bf16 x bf16 -> f32); bias + ReLU in f32.
    h = jnp.dot(x_ref[...], w1_ref[...], preferred_element_type=jnp.float32)
    h = jnp.maximum(h + b1_ref[...], 0.0)
    # Dropout(p) is identity in eval mode.
    # TODO(synk): training-mode dropout (pltpu.prng_seed / prng_random_bits mask
    #             with 1/(1-p) scaling) is not wired in.

    # Second matmul chunk: accumulate this 4H-chunk's contribution directly into
    # the resident f32 output tile.
    o_ref[...] += jnp.dot(h.astype(w2_ref.dtype), w2_ref[...],
                          preferred_element_type=jnp.float32)


def feed_forward(x, w1, b1, w2, b2, *, tm=512, tk=None, tn=None):
    """x: [M, H].  Returns [M, H] float32 = relu(x @ w1 + b1) @ w2 + b2."""
    M, H = x.shape
    H4 = w1.shape[1]
    assert w1.shape == (H, H4) and w2.shape == (H4, H)
    assert b1.shape == (H4,) and b2.shape == (H,)

    # Generation-aware VMEM budget with headroom for compiler internal scratch and
    # the auto double-buffers (~51 MiB on v7x's 64 MiB/TC, ~100 MiB on v5e/v6e).
    budget = min(int(_vmem_capacity_bytes() * 0.8), 100 << 20)

    # Token tile: large by default to amortize weight streaming, clamped to M.
    tm = max(8, min(_round_up(int(tm), 8), _round_up(M, 8)))

    # Output tile over H (third grid axis); defaults to the full hidden dim.
    tn = H if tn is None else int(tn)
    if tn != H:
        assert H % tn == 0 and tn % 128 == 0, "tn must divide H and be a multiple of 128"

    # Reduction chunk over 4H.
    tk_full = _round_up(H4, 128)
    if tk is None:
        # Weights-resident fast path: a single reduction chunk and a single output
        # tile make the w1/w2 block indices constant, so the pipeline DMAs the
        # weights from HBM exactly once for the whole call.
        if tn == H and _vmem_footprint(tm, tk_full, tn, H) <= budget:
            tk = tk_full
        else:
            tk = min(1024, tk_full)
    tk = min(_round_up(int(tk), 128), tk_full)

    # Shrink tiles until the double-buffered working set fits the budget.
    while _vmem_footprint(tm, tk, tn, H) > budget:
        if tk > 512:
            tk = max(128, _round_up(tk // 2, 128))
        elif tm > 256:
            tm = max(8, _round_up(tm // 2, 8))
        elif tn > 128 and (tn // 2) % 128 == 0 and H % (tn // 2) == 0:
            tn //= 2
        elif tk > 128:
            tk = max(128, _round_up(tk // 2, 128))
        elif tm > 8:
            tm = max(8, _round_up(tm // 2, 8))
        else:
            break

    # Pad tokens to the token tile and 4H to the reduction chunk (zero-padded w1
    # columns / b1 entries / w2 rows contribute exactly zero).
    m_pad = _round_up(M, tm)
    h4_pad = _round_up(H4, tk)

    x_p = jnp.pad(x, ((0, m_pad - M), (0, 0))) if m_pad != M else x
    if h4_pad != H4:
        w1 = jnp.pad(w1, ((0, 0), (0, h4_pad - H4)))
        b1 = jnp.pad(b1, ((0, h4_pad - H4),))
        w2 = jnp.pad(w2, ((0, h4_pad - H4), (0, 0)))

    # bf16 MXU operands (cast only if needed), f32 biases / accumulation.
    x_bf = x_p if x_p.dtype == jnp.bfloat16 else x_p.astype(jnp.bfloat16)
    w1_bf = w1 if w1.dtype == jnp.bfloat16 else w1.astype(jnp.bfloat16)
    w2_bf = w2 if w2.dtype == jnp.bfloat16 else w2.astype(jnp.bfloat16)
    b1_2d = b1.reshape(1, h4_pad).astype(jnp.float32)
    b2_2d = b2.reshape(1, H).astype(jnp.float32)

    grid = (m_pad // tm, H // tn, h4_pad // tk)

    footprint = _vmem_footprint(tm, tk, tn, H)
    vmem_limit = int(min(max(footprint + (8 << 20), 32 << 20), budget))

    cost = pl.CostEstimate(
        flops=2 * m_pad * H * h4_pad * 2,          # two matmuls
        transcendentals=0,
        bytes_accessed=(m_pad * H * 2              # x (bf16)
                        + H * h4_pad * 2 + h4_pad * 4
                        + h4_pad * H * 2 + H * 4
                        + m_pad * H * 4),          # out (f32)
    )

    out = pl.pallas_call(
        _ffn_kernel,
        out_shape=jax.ShapeDtypeStruct((m_pad, H), jnp.float32),
        grid_spec=pltpu.PrefetchScalarGridSpec(
            num_scalar_prefetch=0,
            grid=grid,
            in_specs=[
                pl.BlockSpec((tm, H), lambda i, j, k: (i, 0)),    # x token tile
                pl.BlockSpec((H, tk), lambda i, j, k: (0, k)),    # w1 column chunk
                pl.BlockSpec((1, tk), lambda i, j, k: (0, k)),    # b1 chunk
                pl.BlockSpec((tk, tn), lambda i, j, k: (k, j)),   # w2 chunk
                pl.BlockSpec((1, tn), lambda i, j, k: (0, j)),    # b2 chunk
            ],
            out_specs=pl.BlockSpec((tm, tn), lambda i, j, k: (i, j)),
        ),
        compiler_params=pltpu.CompilerParams(
            dimension_semantics=("parallel", "parallel", "arbitrary"),
            vmem_limit_bytes=vmem_limit,
        ),
        cost_estimate=cost,
    )(x_bf, w1_bf, b1_2d, w2_bf, b2_2d)

    return out[:M] if m_pad != M else out


def feed_forward_layer(x, params, *, tm=512, tk=None, tn=None):
    """Accepts x of shape [..., H]; flattens leading dims to tokens."""
    w1, b1, w2, b2 = params
    H = x.shape[-1]
    lead = x.shape[:-1]
    y2 = feed_forward(x.reshape(-1, H), w1, b1, w2, b2, tm=tm, tk=tk, tn=tn)
    return y2.reshape(*lead, H)


def init_params(key, hidden_dim):
    """Deterministic init mimicking nn.Linear (uniform +/- 1/sqrt(fan_in))."""
    h4 = hidden_dim * 4
    k1, k2, k3, k4 = jax.random.split(key, 4)
    lim1 = 1.0 / jnp.sqrt(hidden_dim)
    lim2 = 1.0 / jnp.sqrt(h4)
    w1 = jax.random.uniform(k1, (hidden_dim, h4), jnp.float32, -lim1, lim1)
    b1 = jax.random.uniform(k2, (h4,), jnp.float32, -lim1, lim1)
    w2 = jax.random.uniform(k3, (h4, hidden_dim), jnp.float32, -lim2, lim2)
    b2 = jax.random.uniform(k4, (hidden_dim,), jnp.float32, -lim2, lim2)
    return w1, b1, w2, b2


if __name__ == "__main__":
    key = jax.random.PRNGKey(0)
    hidden_dim = 256          # small, lane-aligned stand-in for 768 (4H = 1024)
    batch, seq = 2, 8         # 16 tokens; exercises the tm-clamp path

    kx, kp = jax.random.split(key)
    x = jax.random.normal(kx, (batch, seq, hidden_dim), jnp.float32)
    params = init_params(kp, hidden_dim)

    y = feed_forward_layer(x, params)
    y = jax.block_until_ready(y)

    # Pure-JAX reference with the same bf16-operand / f32-accumulation recipe
    # (eval-mode dropout == identity).
    w1, b1, w2, b2 = params
    h_ref = jnp.dot(x.astype(jnp.bfloat16), w1.astype(jnp.bfloat16),
                    preferred_element_type=jnp.float32) + b1
    h_ref = jnp.maximum(h_ref, 0.0)
    ref = jnp.dot(h_ref.astype(jnp.bfloat16), w2.astype(jnp.bfloat16),
                  preferred_element_type=jnp.float32) + b2

    assert y.shape == x.shape
    assert jnp.allclose(y, ref, atol=2e-2, rtol=2e-2), float(jnp.max(jnp.abs(y - ref)))

    print("KERNEL_OK")
</pallas_src>

<mosaic_0001>
module attributes {stable_mosaic.version = 11 : i64} {
  func.func @_ffn_kernel(%arg0: i32, %arg1: i32, %arg2: i32, %arg3: memref<16x256xbf16, #tpu.memory_space<vmem>>, %arg4: memref<256x1024xbf16, #tpu.memory_space<vmem>>, %arg5: memref<1x1024xf32, #tpu.memory_space<vmem>>, %arg6: memref<1024x256xbf16, #tpu.memory_space<vmem>>, %arg7: memref<1x256xf32, #tpu.memory_space<vmem>>, %arg8: memref<16x256xf32, #tpu.memory_space<vmem>>) attributes {dimension_semantics = [#tpu.dimension_semantics<parallel>, #tpu.dimension_semantics<parallel>, #tpu.dimension_semantics<arbitrary>], iteration_bounds = array<i64: 1, 1, 1>, scalar_prefetch = 0 : i64, scratch_operands = 0 : i64, tpu.core_type = #tpu.core_type<tc>, window_params = [{transform_indices = @transform_0, window_bounds = array<i64: 16, 256>}, {transform_indices = @transform_1, window_bounds = array<i64: 256, 1024>}, {transform_indices = @transform_2, window_bounds = array<i64: 1, 1024>}, {transform_indices = @transform_3, window_bounds = array<i64: 1024, 256>}, {transform_indices = @transform_4, window_bounds = array<i64: 1, 256>}, {transform_indices = @transform_5, window_bounds = array<i64: 16, 256>}]} {
    %c0_i32 = arith.constant 0 : i32
    %0 = arith.cmpi eq, %arg2, %c0_i32 : i32
    %1 = arith.extui %0 : i1 to i32
    %c0_i32_0 = arith.constant 0 : i32
    %2 = arith.cmpi ne, %1, %c0_i32_0 : i32
    scf.if %2 {
      %c0_14 = arith.constant 0 : index
      %c0_15 = arith.constant 0 : index
      %17 = vector.load %arg7[%c0_14, %c0_15] : memref<1x256xf32, #tpu.memory_space<vmem>>, vector<1x256xf32>
      %18 = vector.shape_cast %17 : vector<1x256xf32> to vector<1x256xf32>
      %19 = vector.broadcast %18 : vector<1x256xf32> to vector<16x256xf32>
      %c0_16 = arith.constant 0 : index
      %c0_17 = arith.constant 0 : index
      %20 = vector.load %arg8[%c0_16, %c0_17] : memref<16x256xf32, #tpu.memory_space<vmem>>, vector<16x256xf32>
      tpu.vector_store %arg8[%c0_16, %c0_17], %19 {strides = array<i32>} : memref<16x256xf32, #tpu.memory_space<vmem>>, vector<16x256xf32>,
    } else {
    }
    %c0 = arith.constant 0 : index
    %c0_1 = arith.constant 0 : index
    %3 = vector.load %arg3[%c0, %c0_1] : memref<16x256xbf16, #tpu.memory_space<vmem>>, vector<16x256xbf16>
    %c0_2 = arith.constant 0 : index
    %c0_3 = arith.constant 0 : index
    %4 = vector.load %arg4[%c0_2, %c0_3] : memref<256x1024xbf16, #tpu.memory_space<vmem>>, vector<256x1024xbf16>
    %cst = arith.constant dense<0.000000e+00> : vector<16x1024xf32>
    %5 = tpu.matmul %3, %4, %cst {dimension_numbers = #tpu.dot_dimension_numbers<[1], [0], [0], [1], [0, 0, 1, 1], [], []>} : vector<16x256xbf16>, vector<256x1024xbf16>, vector<16x1024xf32> -> vector<16x1024xf32>
    %c0_4 = arith.constant 0 : index
    %c0_5 = arith.constant 0 : index
    %6 = vector.load %arg5[%c0_4, %c0_5] : memref<1x1024xf32, #tpu.memory_space<vmem>>, vector<1x1024xf32>
    %7 = vector.broadcast %6 : vector<1x1024xf32> to vector<16x1024xf32>
    %8 = arith.addf %5, %7 : vector<16x1024xf32>
    %cst_6 = arith.constant 0.000000e+00 : f32
    %9 = vector.broadcast %cst_6 : f32 to vector<16x1024xf32>
    %10 = arith.maximumf %8, %9 : vector<16x1024xf32>
    %c0_7 = arith.constant 0 : index
    %c0_8 = arith.constant 0 : index
    %11 = vector.load %arg8[%c0_7, %c0_8] : memref<16x256xf32, #tpu.memory_space<vmem>>, vector<16x256xf32>
    %12 = arith.truncf %10 : vector<16x1024xf32> to vector<16x1024xbf16>
    %c0_9 = arith.constant 0 : index
    %c0_10 = arith.constant 0 : index
    %13 = vector.load %arg6[%c0_9, %c0_10] : memref<1024x256xbf16, #tpu.memory_space<vmem>>, vector<1024x256xbf16>
    %cst_11 = arith.constant dense<0.000000e+00> : vector<16x256xf32>
    %14 = tpu.matmul %12, %13, %cst_11 {dimension_numbers = #tpu.dot_dimension_numbers<[1], [0], [0], [1], [0, 0, 1, 1], [], []>} : vector<16x1024xbf16>, vector<1024x256xbf16>, vector<16x256xf32> -> vector<16x256xf32>
    %15 = arith.addf %11, %14 : vector<16x256xf32>
    %c0_12 = arith.constant 0 : index
    %c0_13 = arith.constant 0 : index
    %16 = vector.load %arg8[%c0_12, %c0_13] : memref<16x256xf32, #tpu.memory_space<vmem>>, vector<16x256xf32>
    tpu.vector_store %arg8[%c0_12, %c0_13], %15 {strides = array<i32>} : memref<16x256xf32, #tpu.memory_space<vmem>>, vector<16x256xf32>,
    return
  }
  func.func @transform_0(%arg0: i32, %arg1: i32, %arg2: i32) -> (i32, i32) {
    %c0_i32 = arith.constant 0 : i32
    %c0_i32_0 = arith.constant 0 : i32
    return %arg0, %c0_i32 : i32, i32
  }
  func.func @transform_1(%arg0: i32, %arg1: i32, %arg2: i32) -> (i32, i32) {
    %c0_i32 = arith.constant 0 : i32
    %c0_i32_0 = arith.constant 0 : i32
    return %c0_i32, %arg2 : i32, i32
  }
  func.func @transform_2(%arg0: i32, %arg1: i32, %arg2: i32) -> (i32, i32) {
    %c0_i32 = arith.constant 0 : i32
    %c0_i32_0 = arith.constant 0 : i32
    return %c0_i32, %arg2 : i32, i32
  }
  func.func @transform_3(%arg0: i32, %arg1: i32, %arg2: i32) -> (i32, i32) {
    %c0_i32 = arith.constant 0 : i32
    return %arg2, %arg1 : i32, i32
  }
  func.func @transform_4(%arg0: i32, %arg1: i32, %arg2: i32) -> (i32, i32) {
    %c0_i32 = arith.constant 0 : i32
    %c0_i32_0 = arith.constant 0 : i32
    return %c0_i32, %arg1 : i32, i32
  }
  func.func @transform_5(%arg0: i32, %arg1: i32, %arg2: i32) -> (i32, i32) {
    %c0_i32 = arith.constant 0 : i32
    return %arg0, %arg1 : i32, i32
  }
}

</mosaic_0001>

<bundles_post_ra>
// kernel: tpu_custom_call.1
= control target key start
LH: loop header
LB: loop body
LE: loop exit
PB: predicated region body
PF: predicated region fallthrough
CT: control target
= control target key end

     0   :  { %10 = vsyncpa [#allocation3], 0  ;;  %s2834_s0 = inlined_call_operand.hbm [shape: bf16[16,256], index: 0, kind: input, shape index: {}]   ;;  %s2835_s1 = inlined_call_operand.hbm [shape: bf16[256,1024], index: 1, kind: input, shape index: {}]   ;;  %s2836_s2 = inlined_call_operand.hbm [shape: f32[1,1024], index: 2, kind: input, shape index: {}]   ;;  %s2837_s3 = inlined_call_operand.hbm [shape: bf16[1024,256], index: 3, kind: input, shape index: {}]   ;;  %s2838_s4 = inlined_call_operand.vmem [shape: f32[1,256], index: 4, kind: input, shape index: {}]   ;;  %s2839_s5 = inlined_call_operand.hbm [shape: f32[16,256], index: 5, kind: output, shape index: {}]  }
   0x1   :  { %11 = vsyncpa [#allocation6], 0 }
   0x2   :  { %12 = vsyncpa [#allocation9], 0 }
   0x3   :  { %13 = vsyncpa [#allocation4], 0  ;;  %s2677_s18 = smov [#allocation5]   ;;  %s2559_s22 = scalar_lea.hbm %s2835_s1, 16384 }
   0x4   :  { %s31_s19 = sshll.u32 %s2677_s18, 4  ;;  %p2560_p0 = scmp.ne.s32.totalorder %s2835_s1, %s2559_s22  ;;  %s32_s19 = int_to_ptr.vmem [resolvable:$true] %s31_s19 }
   0x5   :  { %p2563_p1 = scmp.lt.u32.totalorder %s2559_s22, %s2835_s1 }
   0x7   :  { %p2565_p2 = pnand %p2563_p1, %p2560_p0 }
   0x9   :  { %2568 = shalt.err (!%p2565_p2)
}
   0xa   :  { %s2569_s27 = scalar_lea.vmem %s32_s19, 16384  ;;  %p2574_p4 = scmp.lt.s32.totalorder %s32_s19, %s32_s19 }
   0xb   :  { %p2570_p3 = scmp.ne.s32.totalorder %s32_s19, %s2569_s27  ;;  %p2575_p5 = scmp.lt.s32.totalorder %s2569_s27, %s2569_s27 }
   0xd   :  { %p2576_p6 = por %p2575_p5, %p2574_p4 }
   0xf   :  { %p2577_p7 = pnand %p2576_p6, %p2570_p3 }
  0x11   :  { %2580 = shalt.err (!%p2577_p7)
}
  0x12   :  { %s2678_s28 = smov 512   ;;  %s2679_s29 = smov 32  }
  0x13   :  { %37 = dma.hbm_to_vmem [thread:$0]  %s2835_s1, 16384, %s32_s19, [#allocation6], %s2678_s28, %s2678_s28, %s2679_s29  }
  0x14   :  { %s2680_s7 = smov [#allocation2]   ;;  %s2581_s11 = scalar_lea.hbm %s2834_s0, 256 }
  0x15   :  { %s19_s8 = sshll.u32 %s2680_s7, 4  ;;  %p2582_p8 = scmp.ne.s32.totalorder %s2834_s0, %s2581_s11  ;;  %s20_s8 = int_to_ptr.vmem [resolvable:$true] %s19_s8 }
  0x16   :  { %p2585_p9 = scmp.lt.u32.totalorder %s2581_s11, %s2834_s0 }
  0x18   :  { %p2587_p10 = pnand %p2585_p9, %p2582_p8 }
  0x1a   :  { %2590 = shalt.err (!%p2587_p10)
}
  0x1b   :  { %s2591_s16 = scalar_lea.vmem %s20_s8, 256  ;;  %p2596_p12 = scmp.lt.s32.totalorder %s20_s8, %s20_s8 }
  0x1c   :  { %p2592_p11 = scmp.ne.s32.totalorder %s20_s8, %s2591_s16  ;;  %p2597_p13 = scmp.lt.s32.totalorder %s2591_s16, %s2591_s16 }
  0x1e   :  { %p2598_p0 = por %p2597_p13, %p2596_p12 }
  0x20   :  { %p2599_p1 = pnand %p2598_p0, %p2592_p11 }
  0x22   :  { %2602 = shalt.err (!%p2599_p1)
}
  0x23   :  { %s2681_s1 = smov 128   ;;  %s2682_s17 = smov 8  }
  0x24   :  { %25 = dma.hbm_to_vmem [thread:$0]  %s2834_s0, 256, %s20_s8, [#allocation3], %s2681_s1, %s2681_s1, %s2682_s17  }
  0x25   :  { %s2683_s20 = smov [#allocation7]   ;;  %s2684_s22 = smov [#allocation8]  }
  0x26   :  { %s44_s21 = sshll.u32 %s2683_s20, 4  ;;  %s53_s23 = sshll.u32 %s2684_s22, 4  ;;  %s45_s21 = int_to_ptr.vmem [resolvable:$true] %s44_s21  ;;  %s2745_s23 = int_to_ptr.vmem [resolvable:$true] %s53_s23 }
  0x27   :  { %s2603_s26 = scalar_lea.hbm %s2836_s2, 128 }
  0x28   :  { %p2604_p2 = scmp.ne.s32.totalorder %s2836_s2, %s2603_s26  ;;  %p2607_p3 = scmp.lt.u32.totalorder %s2603_s26, %s2836_s2 }
  0x2a   :  { %p2609_p4 = pnand %p2607_p3, %p2604_p2 }
  0x2c   :  { %2612 = shalt.err (!%p2609_p4)
}
  0x2d   :  { %s2613_s0 = scalar_lea.vmem %s45_s21, 128  ;;  %p2618_p6 = scmp.lt.s32.totalorder %s45_s21, %s45_s21 }
  0x2e   :  { %p2614_p5 = scmp.ne.s32.totalorder %s45_s21, %s2613_s0  ;;  %p2619_p7 = scmp.lt.s32.totalorder %s2613_s0, %s2613_s0 }
  0x30   :  { %p2620_p8 = por %p2619_p7, %p2618_p6 }
  0x32   :  { %p2621_p9 = pnand %p2620_p8, %p2614_p5 }
  0x34   :  { %2624 = shalt.err (!%p2621_p9)
}
  0x35   :  { %47 = dma.hbm_to_vmem [thread:$0]  %s2836_s2, 128, %s45_s21, [#allocation6]  }
  0x36   :  { %s2625_s10 = scalar_lea.hbm %s2837_s3, 16384 }
  0x37   :  { %p2626_p10 = scmp.ne.s32.totalorder %s2837_s3, %s2625_s10  ;;  %p2629_p11 = scmp.lt.u32.totalorder %s2625_s10, %s2837_s3 }
  0x39   :  { %p2631_p12 = pnand %p2629_p11, %p2626_p10 }
  0x3b   :  { %2634 = shalt.err (!%p2631_p12)
}
  0x3c   :  { %s2635_s15 = scalar_lea.vmem %s2745_s23, 16384  ;;  %p2640_p0 = scmp.lt.s32.totalorder %s2745_s23, %s2745_s23 }
  0x3d   :  { %p2636_p13 = scmp.ne.s32.totalorder %s2745_s23, %s2635_s15  ;;  %p2641_p1 = scmp.lt.s32.totalorder %s2635_s15, %s2635_s15 }
  0x3f   :  { %p2642_p2 = por %p2641_p1, %p2640_p0 }
  0x41   :  { %p2643_p3 = pnand %p2642_p2, %p2636_p13 }
  0x43   :  { %2646 = shalt.err (!%p2643_p3)
}
  0x44   :  { %59 = dma.hbm_to_vmem [thread:$0]  %s2837_s3, 16384, %s2745_s23, [#allocation9], %s2681_s1, %s2681_s1, %s2682_s17  }
  0x45   :  { %2669 = dma.done.wait [#allocation3], 256  }
  0x46   :  { %2670 = vsyncadd [#allocation3], 4294967040 }
  0x47   :  { %2671 = dma.done.wait [#allocation6], 16512  }
  0x48   :  { %2672 = vsyncadd [#allocation6], 4294950784 }
  0x49   :  { %2673 = dma.done.wait [#allocation9], 16384  }
  0x4a   :  { %2674 = vsyncadd [#allocation9], 4294950912  ;;  %v96_v0 = vld [vmem:[#allocation5] sm:$0xff]  ;;  %v2779_v17 = vld [vmem:[#allocation2 + $0x4] ss:$8 sps:$4 sm:$0xff]   ;;  %s2685_s17 = smov [#allocation10]  }
  0x4b   :  { %v100_v1 = vld [vmem:[#allocation5 + $0x20] sm:$0xff]  ;;  %948 = vmatprep.mubr.bf16.mxu1 %v2779_v17  ;;  %v97_v63 = vld [vmem:[#allocation5 + $0x8] sm:$0xff]  ;;  %s2069_s18 = sshll.u32 %s2685_s17, 4  ;;  %s2070_s18 = int_to_ptr.vmem [resolvable:$true] %s2069_s18 }
  0x4c   :  { %v104_v2 = vld [vmem:[#allocation5 + $0x40] sm:$0xff]  ;;  %v2086_v3 = vcombine.high %v96_v0, %v100_v1  ;;  %v2085_v4 = vcombine.low %v96_v0, %v100_v1  ;;  %v101_v0 = vld [vmem:[#allocation5 + $0x28] sm:$0xff]  ;;  %p2652_p5 = scmp.lt.s32.totalorder %s2070_s18, %s2070_s18 }
  0x4d   :  { %v108_v5 = vld [vmem:[#allocation5 + $0x60] sm:$0xff] }
  0x4e   :  { %v2094_v6 = vcombine.high %v104_v2, %v108_v5  ;;  %v112_v7 = vld [vmem:[#allocation5 + $0x80] sm:$0xff]  ;;  %916 = vmatprep.subr.bf16.mxu1 %v2086_v3  ;;  %v2093_v9 = vcombine.low %v104_v2, %v108_v5  ;;  %v105_v3 = vld [vmem:[#allocation5 + $0x48] sm:$0xff]  ;;  %v2782_v5 = vld [vmem:[#allocation2] ss:$8 sps:$4 sm:$0xff]  }
  0x4f   :  { %v116_v8 = vld [vmem:[#allocation5 + $0xa0] sm:$0xff]  ;;  %917 = vmatpush1.bf16.msra.mxu1 %v2085_v4  ;;  %v109_v4 = vld [vmem:[#allocation5 + $0x68] sm:$0xff] }
  0x50   :  { %918 = vmatprep.subr.bf16.mxu1 %v2094_v6  ;;  %v2102_v10 = vcombine.high %v112_v7, %v116_v8  ;;  %v120_v11 = vld [vmem:[#allocation5 + $0xc0] sm:$0xff]  ;;  %v2101_v13 = vcombine.low %v112_v7, %v116_v8  ;;  %v2088_v6 = vcombine.high %v97_v63, %v101_v0  ;;  %v2087_v7 = vcombine.low %v97_v63, %v101_v0  ;;  %v113_v8 = vld [vmem:[#allocation5 + $0x88] sm:$0xff] }
  0x51   :  { %v124_v12 = vld [vmem:[#allocation5 + $0xe0] sm:$0xff]  ;;  %v205_v63 = vld [vmem:[#allocation5 + $0x368] sm:$0xff] }
  0x52   :  { %v2110_v14 = vcombine.high %v120_v11, %v124_v12  ;;  %v128_v15 = vld [vmem:[#allocation5 + $0x100] sm:$0xff]  ;;  %v2109_v18 = vcombine.low %v120_v11, %v124_v12  ;;  %v2095_v11 = vcombine.low %v105_v3, %v109_v4  ;;  %v121_v12 = vld [vmem:[#allocation5 + $0xc8] sm:$0xff] }
  0x53   :  { %919 = vmatpush1.bf16.msra.mxu1 %v2093_v9  ;;  %v132_v16 = vld [vmem:[#allocation5 + $0x120] sm:$0xff]  ;;  %v117_v9 = vld [vmem:[#allocation5 + $0xa8] sm:$0xff] }
  0x54   :  { %920 = vmatprep.subr.bf16.mxu1 %v2102_v10  ;;  %v2118_v19 = vcombine.high %v128_v15, %v132_v16  ;;  %v136_v20 = vld [vmem:[#allocation5 + $0x140] sm:$0xff]  ;;  %v2117_v22 = vcombine.low %v128_v15, %v132_v16  ;;  %v2096_v10 = vcombine.high %v105_v3, %v109_v4  ;;  %v2103_v15 = vcombine.low %v113_v8, %v117_v9  ;;  %v129_v16 = vld [vmem:[#allocation5 + $0x108] sm:$0xff] }
  0x55   :  { %v140_v21 = vld [vmem:[#allocation5 + $0x160] sm:$0xff]  ;;  %v2379_v0 = vld [vmem:[#allocation8 + $0x44] ss:$8 sps:$4 sm:$0xff]  }
  0x56   :  { %v2126_v23 = vcombine.high %v136_v20, %v140_v21  ;;  %v144_v24 = vld [vmem:[#allocation5 + $0x180] sm:$0xff]  ;;  %v2125_v26 = vcombine.low %v136_v20, %v140_v21  ;;  %v137_v21 = vld [vmem:[#allocation5 + $0x148] sm:$0xff] }
  0x57   :  { %921 = vmatpush1.bf16.msra.mxu1 %v2101_v13  ;;  %v148_v25 = vld [vmem:[#allocation5 + $0x1a0] sm:$0xff]  ;;  %v125_v13 = vld [vmem:[#allocation5 + $0xe8] sm:$0xff] }
  0x58   :  { %922 = vmatprep.subr.bf16.mxu1 %v2110_v14  ;;  %v2134_v27 = vcombine.high %v144_v24, %v148_v25  ;;  %v152_v28 = vld [vmem:[#allocation5 + $0x1c0] sm:$0xff]  ;;  %v2133_v30 = vcombine.low %v144_v24, %v148_v25  ;;  %v2104_v14 = vcombine.high %v113_v8, %v117_v9  ;;  %v2111_v20 = vcombine.low %v121_v12, %v125_v13  ;;  %v209_v4 = vld [vmem:[#allocation5 + $0x388] sm:$0xff] }
  0x59   :  { %v156_v29 = vld [vmem:[#allocation5 + $0x1e0] sm:$0xff] }
  0x5a   :  { %v2142_v31 = vcombine.high %v152_v28, %v156_v29  ;;  %v160_v32 = vld [vmem:[#allocation5 + $0x200] sm:$0xff]  ;;  %v2141_v34 = vcombine.low %v152_v28, %v156_v29 }
  0x5b   :  { %923 = vmatpush1.bf16.msra.mxu1 %v2109_v18  ;;  %v164_v33 = vld [vmem:[#allocation5 + $0x220] sm:$0xff]  ;;  %v133_v18 = vld [vmem:[#allocation5 + $0x128] sm:$0xff] }
  0x5c   :  { %924 = vmatprep.subr.bf16.mxu1 %v2118_v19  ;;  %v168_v35 = vld [vmem:[#allocation5 + $0x240] sm:$0xff]  ;;  %v2150_v37 = vcombine.high %v160_v32, %v164_v33  ;;  %v2149_v38 = vcombine.low %v160_v32, %v164_v33  ;;  %v2112_v19 = vcombine.high %v121_v12, %v125_v13  ;;  %v2119_v24 = vcombine.low %v129_v16, %v133_v18  ;;  %v221_v12 = vld [vmem:[#allocation5 + $0x3e8] sm:$0xff] }
  0x5d   :  { %v172_v36 = vld [vmem:[#allocation5 + $0x260] sm:$0xff]  ;;  %v2385_v13 = vld [vmem:[#allocation8 + $0x64] ss:$8 sps:$4 sm:$0xff]  }
  0x5e   :  { %v176_v39 = vld [vmem:[#allocation5 + $0x280] sm:$0xff]  ;;  %v2158_v41 = vcombine.high %v168_v35, %v172_v36  ;;  %v2157_v42 = vcombine.low %v168_v35, %v172_v36  ;;  %v165_v35 = vld [vmem:[#allocation5 + $0x228] sm:$0xff] }
  0x5f   :  { %925 = vmatpush1.bf16.msra.mxu1 %v2117_v22  ;;  %v180_v40 = vld [vmem:[#allocation5 + $0x2a0] sm:$0xff]  ;;  %v2120_v22 = vcombine.high %v129_v16, %v133_v18  ;;  %v98_v18 = vld [vmem:[#allocation5 + $0x10] sm:$0xff] }
  0x60   :  { %926 = vmatprep.subr.bf16.mxu1 %v2126_v23  ;;  %v184_v43 = vld [vmem:[#allocation5 + $0x2c0] sm:$0xff]  ;;  %v2166_v45 = vcombine.high %v176_v39, %v180_v40  ;;  %v2165_v46 = vcombine.low %v176_v39, %v180_v40  ;;  %v141_v23 = vld [vmem:[#allocation5 + $0x168] sm:$0xff] }
  0x61   :  { %v188_v44 = vld [vmem:[#allocation5 + $0x2e0] sm:$0xff]  ;;  %v2128_v25 = vcombine.high %v137_v21, %v141_v23  ;;  %v2127_v28 = vcombine.low %v137_v21, %v141_v23  ;;  %v173_v39 = vld [vmem:[#allocation5 + $0x268] sm:$0xff] }
  0x62   :  { %v192_v47 = vld [vmem:[#allocation5 + $0x300] sm:$0xff]  ;;  %v2174_v49 = vcombine.high %v184_v43, %v188_v44  ;;  %v2173_v50 = vcombine.low %v184_v43, %v188_v44  ;;  %v2367_v40 = vld [vmem:[#allocation8 + $0x4] ss:$8 sps:$4 sm:$0xff]  }
  0x63   :  { %927 = vmatpush1.bf16.msra.mxu1 %v2125_v26  ;;  %v196_v48 = vld [vmem:[#allocation5 + $0x320] sm:$0xff]  ;;  %v145_v26 = vld [vmem:[#allocation5 + $0x188] sm:$0xff]  ;;  %1884 = vmatprep.subr.bf16.mxu0 %v2367_v40 }
  0x64   :  { %928 = vmatprep.subr.bf16.mxu1 %v2134_v27  ;;  %v200_v51 = vld [vmem:[#allocation5 + $0x340] sm:$0xff]  ;;  %v2182_v53 = vcombine.high %v192_v47, %v196_v48  ;;  %v2181_v54 = vcombine.low %v192_v47, %v196_v48  ;;  %v149_v27 = vld [vmem:[#allocation5 + $0x1a8] sm:$0xff] }
  0x65   :  { %v204_v52 = vld [vmem:[#allocation5 + $0x360] sm:$0xff]  ;;  %v2136_v29 = vcombine.high %v145_v26, %v149_v27  ;;  %v2135_v32 = vcombine.low %v145_v26, %v149_v27  ;;  %v177_v44 = vld [vmem:[#allocation5 + $0x288] sm:$0xff] }
  0x66   :  { %v208_v55 = vld [vmem:[#allocation5 + $0x380] sm:$0xff]  ;;  %v2190_v57 = vcombine.high %v200_v51, %v204_v52  ;;  %v2189_v58 = vcombine.low %v200_v51, %v204_v52  ;;  %v189_v51 = vld [vmem:[#allocation5 + $0x2e8] sm:$0xff] }
  0x67   :  { %929 = vmatpush1.bf16.msra.mxu1 %v2133_v30  ;;  %v212_v56 = vld [vmem:[#allocation5 + $0x3a0] sm:$0xff]  ;;  %v153_v30 = vld [vmem:[#allocation5 + $0x1c8] sm:$0xff] }
  0x68   :  { %930 = vmatprep.subr.bf16.mxu1 %v2142_v31  ;;  %v216_v59 = vld [vmem:[#allocation5 + $0x3c0] sm:$0xff]  ;;  %v2198_v61 = vcombine.high %v208_v55, %v212_v56  ;;  %v2197_v62 = vcombine.low %v208_v55, %v212_v56  ;;  %v157_v31 = vld [vmem:[#allocation5 + $0x1e8] sm:$0xff] }
  0x69   :  { %v220_v60 = vld [vmem:[#allocation5 + $0x3e0] sm:$0xff]  ;;  %v2144_v33 = vcombine.high %v153_v30, %v157_v31  ;;  %v2143_v36 = vcombine.low %v153_v30, %v157_v31  ;;  %v2373_v52 = vld [vmem:[#allocation8 + $0x24] ss:$8 sps:$4 sm:$0xff]  }
  0x6a   :  { %v2206_v1 = vcombine.high %v216_v59, %v220_v60  ;;  %v2205_v2 = vcombine.low %v216_v59, %v220_v60  ;;  %v2372_v48 = vld [vmem:[#allocation8 + $0x10] ss:$8 sps:$4 sm:$0xff]   ;;  %v193_v56 = vld [vmem:[#allocation5 + $0x308] sm:$0xff]  ;;  %v114_v30 = vld [vmem:[#allocation5 + $0x90] sm:$0xff] }
  0x6b   :  { %931 = vmatpush1.bf16.msra.mxu1 %v2141_v34  ;;  %v161_v34 = vld [vmem:[#allocation5 + $0x208] sm:$0xff]  ;;  %v2378_v60 = vld [vmem:[#allocation8 + $0x30] ss:$8 sps:$4 sm:$0xff]   ;;  %v118_v31 = vld [vmem:[#allocation5 + $0xb0] sm:$0xff] }
  0x6c   :  { %932 = vmatprep.subr.bf16.mxu1 %v2150_v37  ;;  %v2152_v37 = vcombine.high %v161_v34, %v165_v35  ;;  %v2384_v9 = vld [vmem:[#allocation8 + $0x50] ss:$8 sps:$4 sm:$0xff]   ;;  %v2391_v26 = vld [vmem:[#allocation8 + $0x84] ss:$8 sps:$4 sm:$0xff]   ;;  %v2400_v40 = vld [vmem:[#allocation8 + $0xb4] ss:$8 sps:$4 sm:$0xff]  }
  0x6f   :  { %933 = vmatpush1.bf16.msra.mxu1 %v2149_v38  ;;  %v169_v38 = vld [vmem:[#allocation5 + $0x248] sm:$0xff] }
  0x70   :  { %934 = vmatprep.subr.bf16.mxu1 %v2158_v41  ;;  %v2151_v41 = vcombine.low %v161_v34, %v165_v35  ;;  %v2160_v43 = vcombine.high %v169_v38, %v173_v39  ;;  %v2159_v47 = vcombine.low %v169_v38, %v173_v39  ;;  %v2397_v34 = vld [vmem:[#allocation8 + $0xa4] ss:$8 sps:$4 sm:$0xff]   ;;  %v2399_v39 = vld [vmem:[#allocation8 + $0xa0] ss:$8 sps:$4 sm:$0xff]  }
  0x71   :  { %v126_v38 = vld [vmem:[#allocation5 + $0xf0] sm:$0xff] }
  0x73   :  { %935 = vmatpush1.bf16.msra.mxu1 %v2157_v42  ;;  %v2369_v42 = vld [vmem:[#allocation8] ss:$8 sps:$4 sm:$0xff]  }
  0x74   :  { %936 = vmatprep.subr.bf16.mxu1 %v2166_v45  ;;  %v181_v45 = vld [vmem:[#allocation5 + $0x2a8] sm:$0xff]  ;;  %1885 = vmatpush1.bf16.msra.mxu0 %v2369_v42 }
  0x77   :  { %937 = vmatpush1.bf16.msra.mxu1 %v2165_v46  ;;  %v2370_v46 = vld [vmem:[#allocation8 + $0x14] ss:$8 sps:$4 sm:$0xff]  }
  0x78   :  { %938 = vmatprep.subr.bf16.mxu1 %v2174_v49  ;;  %v2168_v49 = vcombine.high %v177_v44, %v181_v45  ;;  %1886 = vmatprep.subr.bf16.mxu0 %v2370_v46  ;;  %v2403_v46 = vld [vmem:[#allocation8 + $0xc4] ss:$8 sps:$4 sm:$0xff]  }
  0x79   :  { %1887 = vmatpush1.bf16.msra.mxu0 %v2372_v48 }
  0x7a   :  { %1888 = vmatprep.subr.bf16.mxu0 %v2373_v52  ;;  %v2406_v52 = vld [vmem:[#allocation8 + $0xd4] ss:$8 sps:$4 sm:$0xff]  }
  0x7b   :  { %939 = vmatpush1.bf16.msra.mxu1 %v2173_v50  ;;  %v185_v50 = vld [vmem:[#allocation5 + $0x2c8] sm:$0xff] }
  0x7c   :  { %940 = vmatprep.subr.bf16.mxu1 %v2182_v53  ;;  %v2167_v53 = vcombine.low %v177_v44, %v181_v45  ;;  %v2176_v55 = vcombine.high %v185_v50, %v189_v51  ;;  %v2175_v59 = vcombine.low %v185_v50, %v189_v51  ;;  %v134_v44 = vld [vmem:[#allocation5 + $0x130] sm:$0xff]  ;;  %v2402_v45 = vld [vmem:[#allocation8 + $0xb0] ss:$8 sps:$4 sm:$0xff]  }
  0x7d   :  { %v142_v50 = vld [vmem:[#allocation5 + $0x170] sm:$0xff] }
  0x7e   :  { %v2405_v51 = vld [vmem:[#allocation8 + $0xc0] ss:$8 sps:$4 sm:$0xff]  }
  0x7f   :  { %941 = vmatpush1.bf16.msra.mxu1 %v2181_v54  ;;  %v2375_v54 = vld [vmem:[#allocation8 + $0x20] ss:$8 sps:$4 sm:$0xff]  }
  0x80   :  { %942 = vmatprep.subr.bf16.mxu1 %v2190_v57  ;;  %v197_v57 = vld [vmem:[#allocation5 + $0x328] sm:$0xff]  ;;  %1889 = vmatpush1.bf16.msra.mxu0 %v2375_v54 }
  0x83   :  { %943 = vmatpush1.bf16.msra.mxu1 %v2189_v58  ;;  %v2376_v58 = vld [vmem:[#allocation8 + $0x34] ss:$8 sps:$4 sm:$0xff]  }
  0x84   :  { %944 = vmatprep.subr.bf16.mxu1 %v2198_v61  ;;  %v2184_v61 = vcombine.high %v193_v56, %v197_v57  ;;  %1890 = vmatprep.subr.bf16.mxu0 %v2376_v58  ;;  %v2408_v58 = vld [vmem:[#allocation8 + $0xd0] ss:$8 sps:$4 sm:$0xff]  }
  0x85   :  { %1891 = vmatpush1.bf16.msra.mxu0 %v2378_v60  ;;  %v154_v60 = vld [vmem:[#allocation5 + $0x1d0] sm:$0xff] }
  0x86   :  { %1892 = vmatprep.subr.bf16.mxu0 %v2379_v0  ;;  %v2411_v0 = vld [vmem:[#allocation8 + $0xe0] ss:$8 sps:$4 sm:$0xff]  }
  0x87   :  { %945 = vmatpush1.bf16.msra.mxu1 %v2197_v62  ;;  %v201_v62 = vld [vmem:[#allocation5 + $0x348] sm:$0xff] }
  0x88   :  { %946 = vmatprep.subr.bf16.mxu1 %v2206_v1  ;;  %v2183_v1 = vcombine.low %v193_v56, %v197_v57  ;;  %v2192_v3 = vcombine.high %v201_v62, %v205_v63  ;;  %v2191_v8 = vcombine.low %v201_v62, %v205_v63  ;;  %v150_v56 = vld [vmem:[#allocation5 + $0x1b0] sm:$0xff] }
  0x89   :  { %v2409_v62 = vld [vmem:[#allocation8 + $0xe4] ss:$8 sps:$4 sm:$0xff]  }
  0x8b   :  { %947 = vmatpush1.bf16.msra.mxu1 %v2205_v2  ;;  %v2381_v2 = vld [vmem:[#allocation8 + $0x40] ss:$8 sps:$4 sm:$0xff]  }
  0x8c   :  { %959 = vmatprep.subr.bf16.mxu1 %v2088_v6  ;;  %v213_v6 = vld [vmem:[#allocation5 + $0x3a8] sm:$0xff]  ;;  %1893 = vmatpush1.bf16.msra.mxu0 %v2381_v2  ;;  %v162_v2 = vld [vmem:[#allocation5 + $0x210] sm:$0xff] }
  0x8e   :  { %949 = vmatmul.mubr.bf16.vlgmr.msra.gmra.mrb[0].mxu1 %v2782_v5 }
  0x8f   :  { %960 = vmatpush1.bf16.msra.mxu1 %v2087_v7  ;;  %991 = vmatprep.mubr.bf16.mxu1 %v2779_v17  ;;  %v2382_v7 = vld [vmem:[#allocation8 + $0x54] ss:$8 sps:$4 sm:$0xff]  }
  0x90   :  { %961 = vmatprep.subr.bf16.mxu1 %v2096_v10  ;;  %v2200_v10 = vcombine.high %v209_v4, %v213_v6  ;;  %1894 = vmatprep.subr.bf16.mxu0 %v2382_v7  ;;  %v2414_v7 = vld [vmem:[#allocation8 + $0xf0] ss:$8 sps:$4 sm:$0xff]  }
  0x91   :  { %1895 = vmatpush1.bf16.msra.mxu0 %v2384_v9  ;;  %v170_v9 = vld [vmem:[#allocation5 + $0x250] sm:$0xff] }
  0x92   :  { %1896 = vmatprep.subr.bf16.mxu0 %v2385_v13 }
  0x93   :  { %962 = vmatpush1.bf16.msra.mxu1 %v2095_v11  ;;  %v217_v11 = vld [vmem:[#allocation5 + $0x3c8] sm:$0xff] }
  0x94   :  { %963 = vmatprep.subr.bf16.mxu1 %v2104_v14  ;;  %v2199_v14 = vcombine.low %v209_v4, %v213_v6  ;;  %v2208_v16 = vcombine.high %v217_v11, %v221_v12  ;;  %v2207_v21 = vcombine.low %v217_v11, %v221_v12  ;;  %v2412_v4 = vld [vmem:[#allocation8 + $0xf4] ss:$8 sps:$4 sm:$0xff]   ;;  %v2417_v11 = vld [vmem:[#allocation8 + $0x104] ss:$8 sps:$4 sm:$0xff]  }
  0x97   :  { %964 = vmatpush1.bf16.msra.mxu1 %v2103_v15  ;;  %v2387_v15 = vld [vmem:[#allocation8 + $0x60] ss:$8 sps:$4 sm:$0xff]  }
  0x98   :  { %965 = vmatprep.subr.bf16.mxu1 %v2112_v19  ;;  %v102_v19 = vld [vmem:[#allocation5 + $0x30] sm:$0xff]  ;;  %1897 = vmatpush1.bf16.msra.mxu0 %v2387_v15 }
  0x99   :  { %v2090_v23 = vcombine.high %v98_v18, %v102_v19  ;;  %v2089_v27 = vcombine.low %v98_v18, %v102_v19  ;;  %v182_v15 = vld [vmem:[#allocation5 + $0x2b0] sm:$0xff] }
  0x9a   :  { %v186_v19 = vld [vmem:[#allocation5 + $0x2d0] sm:$0xff] }
  0x9b   :  { %966 = vmatpush1.bf16.msra.mxu1 %v2111_v20  ;;  %v2388_v20 = vld [vmem:[#allocation8 + $0x74] ss:$8 sps:$4 sm:$0xff]  }
  0x9c   :  { %967 = vmatprep.subr.bf16.mxu1 %v2120_v22  ;;  %v2390_v22 = vld [vmem:[#allocation8 + $0x70] ss:$8 sps:$4 sm:$0xff]   ;;  %1898 = vmatprep.subr.bf16.mxu0 %v2388_v20  ;;  %v190_v20 = vld [vmem:[#allocation5 + $0x2f0] sm:$0xff] }
  0x9d   :  { %1899 = vmatpush1.bf16.msra.mxu0 %v2390_v22  ;;  %v2178_v22 = vcombine.high %v186_v19, %v190_v20 }
  0x9e   :  { %1900 = vmatprep.subr.bf16.mxu0 %v2391_v26 }
  0x9f   :  { %968 = vmatpush1.bf16.msra.mxu1 %v2119_v24  ;;  %v106_v24 = vld [vmem:[#allocation5 + $0x50] sm:$0xff] }
  0xa0   :  { %969 = vmatprep.subr.bf16.mxu1 %v2128_v25  ;;  %v110_v25 = vld [vmem:[#allocation5 + $0x70] sm:$0xff] }
  0xa1   :  { %v2097_v35 = vcombine.low %v106_v24, %v110_v25 }
  0xa3   :  { %970 = vmatpush1.bf16.msra.mxu1 %v2127_v28  ;;  %v2393_v28 = vld [vmem:[#allocation8 + $0x80] ss:$8 sps:$4 sm:$0xff]  }
  0xa4   :  { %971 = vmatprep.subr.bf16.mxu1 %v2136_v29  ;;  %v2098_v29 = vcombine.high %v106_v24, %v110_v25  ;;  %1901 = vmatpush1.bf16.msra.mxu0 %v2393_v28  ;;  %v198_v24 = vld [vmem:[#allocation5 + $0x330] sm:$0xff]  ;;  %v2177_v25 = vcombine.low %v186_v19, %v190_v20  ;;  %v187_v20 = vld [vmem:[#allocation5 + $0x2d8] sm:$0xff] }
  0xa5   :  { %v206_v28 = vld [vmem:[#allocation5 + $0x370] sm:$0xff] }
  0xa7   :  { %972 = vmatpush1.bf16.msra.mxu1 %v2135_v32  ;;  %v2394_v32 = vld [vmem:[#allocation8 + $0x94] ss:$8 sps:$4 sm:$0xff]  }
  0xa8   :  { %973 = vmatprep.subr.bf16.mxu1 %v2144_v33  ;;  %v2396_v33 = vld [vmem:[#allocation8 + $0x90] ss:$8 sps:$4 sm:$0xff]   ;;  %1902 = vmatprep.subr.bf16.mxu0 %v2394_v32  ;;  %v214_v32 = vld [vmem:[#allocation5 + $0x3b0] sm:$0xff] }
  0xa9   :  { %1903 = vmatpush1.bf16.msra.mxu0 %v2396_v33 }
  0xaa   :  { %1904 = vmatprep.subr.bf16.mxu0 %v2397_v34 }
  0xab   :  { %974 = vmatpush1.bf16.msra.mxu1 %v2143_v36  ;;  %v2106_v36 = vcombine.high %v114_v30, %v118_v31 }
  0xac   :  { %975 = vmatprep.subr.bf16.mxu1 %v2152_v37  ;;  %v122_v37 = vld [vmem:[#allocation5 + $0xd0] sm:$0xff] }
  0xad   :  { %v2114_v42 = vcombine.high %v122_v37, %v126_v38  ;;  %1905 = vmatpush1.bf16.msra.mxu0 %v2399_v39  ;;  %v99_v39 = vld [vmem:[#allocation5 + $0x18] sm:$0xff] }
  0xae   :  { %1906 = vmatprep.subr.bf16.mxu0 %v2400_v40  ;;  %v103_v40 = vld [vmem:[#allocation5 + $0x38] sm:$0xff] }
  0xaf   :  { %976 = vmatpush1.bf16.msra.mxu1 %v2151_v41  ;;  %v2105_v41 = vcombine.low %v114_v30, %v118_v31  ;;  %v210_v31 = vld [vmem:[#allocation5 + $0x390] sm:$0xff] }
  0xb0   :  { %977 = vmatprep.subr.bf16.mxu1 %v2160_v43  ;;  %v130_v43 = vld [vmem:[#allocation5 + $0x110] sm:$0xff]  ;;  %v2202_v34 = vcombine.high %v210_v31, %v214_v32 }
  0xb1   :  { %v2122_v48 = vcombine.high %v130_v43, %v134_v44  ;;  %1907 = vmatpush1.bf16.msra.mxu0 %v2402_v45  ;;  %v2091_v45 = vcombine.low %v99_v39, %v103_v40 }
  0xb2   :  { %1908 = vmatprep.subr.bf16.mxu0 %v2403_v46 }
  0xb3   :  { %978 = vmatpush1.bf16.msra.mxu1 %v2159_v47  ;;  %v2113_v47 = vcombine.low %v122_v37, %v126_v38  ;;  %v2201_v37 = vcombine.low %v210_v31, %v214_v32  ;;  %v211_v32 = vld [vmem:[#allocation5 + $0x398] sm:$0xff] }
  0xb4   :  { %979 = vmatprep.subr.bf16.mxu1 %v2168_v49  ;;  %v138_v49 = vld [vmem:[#allocation5 + $0x150] sm:$0xff] }
  0xb5   :  { %v2130_v54 = vcombine.high %v138_v49, %v142_v50  ;;  %1909 = vmatpush1.bf16.msra.mxu0 %v2405_v51  ;;  %v2129_v57 = vcombine.low %v138_v49, %v142_v50  ;;  %v123_v51 = vld [vmem:[#allocation5 + $0xd8] sm:$0xff] }
  0xb6   :  { %1910 = vmatprep.subr.bf16.mxu0 %v2406_v52  ;;  %v127_v52 = vld [vmem:[#allocation5 + $0xf8] sm:$0xff] }
  0xb7   :  { %980 = vmatpush1.bf16.msra.mxu1 %v2167_v53  ;;  %v2121_v53 = vcombine.low %v130_v43, %v134_v44  ;;  %v107_v43 = vld [vmem:[#allocation5 + $0x58] sm:$0xff] }
  0xb8   :  { %981 = vmatprep.subr.bf16.mxu1 %v2176_v55  ;;  %v146_v55 = vld [vmem:[#allocation5 + $0x190] sm:$0xff]  ;;  %v111_v44 = vld [vmem:[#allocation5 + $0x78] sm:$0xff] }
  0xb9   :  { %1911 = vmatpush1.bf16.msra.mxu0 %v2408_v58  ;;  %v2137_v63 = vcombine.low %v146_v55, %v150_v56  ;;  %v2100_v46 = vcombine.high %v107_v43, %v111_v44  ;;  %v2099_v49 = vcombine.low %v107_v43, %v111_v44  ;;  %v2794_v44 = vld [vmem:[#allocation7] sm:$0xff] }
  0xba   :  { %1912 = vmatprep.subr.bf16.mxu0 %v2409_v62  ;;  %v147_v62 = vld [vmem:[#allocation5 + $0x198] sm:$0xff] }
  0xbb   :  { %982 = vmatpush1.bf16.msra.mxu1 %v2175_v59  ;;  %v2138_v59 = vcombine.high %v146_v55, %v150_v56  ;;  %v131_v55 = vld [vmem:[#allocation5 + $0x118] sm:$0xff] }
  0xbc   :  { %983 = vmatprep.subr.bf16.mxu1 %v2184_v61  ;;  %v158_v61 = vld [vmem:[#allocation5 + $0x1f0] sm:$0xff]  ;;  %v135_v56 = vld [vmem:[#allocation5 + $0x138] sm:$0xff] }
  0xbd   :  { %1913 = vmatpush1.bf16.msra.mxu0 %v2411_v0  ;;  %v2145_v6 = vcombine.low %v154_v60, %v158_v61  ;;  %v2124_v58 = vcombine.high %v131_v55, %v135_v56 }
  0xbe   :  { %1914 = vmatprep.subr.bf16.mxu0 %v2412_v4 }
  0xbf   :  { %984 = vmatpush1.bf16.msra.mxu1 %v2183_v1  ;;  %v2146_v1 = vcombine.high %v154_v60, %v158_v61  ;;  %v143_v60 = vld [vmem:[#allocation5 + $0x178] sm:$0xff]  ;;  %v2123_v61 = vcombine.low %v131_v55, %v135_v56 }
  0xc0   :  { %985 = vmatprep.subr.bf16.mxu1 %v2192_v3  ;;  %v166_v3 = vld [vmem:[#allocation5 + $0x230] sm:$0xff] }
  0xc1   :  { %1915 = vmatpush1.bf16.msra.mxu0 %v2414_v7  ;;  %v2153_v12 = vcombine.low %v162_v2, %v166_v3  ;;  %v163_v7 = vld [vmem:[#allocation5 + $0x218] sm:$0xff] }
  0xc2   :  { %1927 = vmatprep.subr.bf16.mxu0 %v2417_v11  ;;  %v171_v11 = vld [vmem:[#allocation5 + $0x258] sm:$0xff] }
  0xc3   :  { %986 = vmatpush1.bf16.msra.mxu1 %v2191_v8  ;;  %v2154_v8 = vcombine.high %v162_v2, %v166_v3  ;;  %v155_v2 = vld [vmem:[#allocation5 + $0x1d8] sm:$0xff] }
  0xc4   :  { %987 = vmatprep.subr.bf16.mxu1 %v2200_v10  ;;  %v174_v10 = vld [vmem:[#allocation5 + $0x270] sm:$0xff]  ;;  %v159_v3 = vld [vmem:[#allocation5 + $0x1f8] sm:$0xff] }
  0xc5   :  { %v2162_v13 = vcombine.high %v170_v9, %v174_v10 }
  0xc7   :  { %988 = vmatpush1.bf16.msra.mxu1 %v2199_v14  ;;  %v178_v14 = vld [vmem:[#allocation5 + $0x290] sm:$0xff] }
  0xc8   :  { %989 = vmatprep.subr.bf16.mxu1 %v2208_v16  ;;  %v2161_v16 = vcombine.low %v170_v9, %v174_v10  ;;  %v2170_v18 = vcombine.high %v178_v14, %v182_v15  ;;  %v2147_v9 = vcombine.low %v155_v2, %v159_v3 }
  0xcb   :  { %990 = vmatpush1.bf16.msra.mxu1 %v2207_v21  ;;  %v2169_v21 = vcombine.low %v178_v14, %v182_v15  ;;  %v179_v15 = vld [vmem:[#allocation5 + $0x298] sm:$0xff] }
  0xcc   :  { %1002 = vmatprep.subr.bf16.mxu1 %v2090_v23  ;;  %v194_v23 = vld [vmem:[#allocation5 + $0x310] sm:$0xff] }
  0xcd   :  { %v2186_v26 = vcombine.high %v194_v23, %v198_v24 }
  0xce   :  { %992 = vmatmul.mubr.bf16.vlgmr.msra.gmra.mrb[4].mxu1 %v2782_v5 }
  0xcf   :  { %1003 = vmatpush1.bf16.msra.mxu1 %v2089_v27  ;;  %1034 = vmatprep.mubr.bf16.mxu1 %v2779_v17  ;;  %v202_v27 = vld [vmem:[#allocation5 + $0x350] sm:$0xff] }
  0xd0   :  { %1004 = vmatprep.subr.bf16.mxu1 %v2098_v29  ;;  %v2185_v29 = vcombine.low %v194_v23, %v198_v24  ;;  %v2194_v30 = vcombine.high %v202_v27, %v206_v28  ;;  %v2193_v33 = vcombine.low %v202_v27, %v206_v28  ;;  %v195_v24 = vld [vmem:[#allocation5 + $0x318] sm:$0xff] }
  0xd1   :  { %v203_v28 = vld [vmem:[#allocation5 + $0x358] sm:$0xff] }
  0xd3   :  { %1005 = vmatpush1.bf16.msra.mxu1 %v2097_v35  ;;  %v218_v35 = vld [vmem:[#allocation5 + $0x3d0] sm:$0xff] }
  0xd4   :  { %1006 = vmatprep.subr.bf16.mxu1 %v2106_v36  ;;  %v222_v36 = vld [vmem:[#allocation5 + $0x3f0] sm:$0xff] }
  0xd5   :  { %v2210_v38 = vcombine.high %v218_v35, %v222_v36 }
  0xd7   :  { %1007 = vmatpush1.bf16.msra.mxu1 %v2105_v41  ;;  %v2209_v41 = vcombine.low %v218_v35, %v222_v36  ;;  %v219_v36 = vld [vmem:[#allocation5 + $0x3d8] sm:$0xff] }
  0xd8   :  { %1008 = vmatprep.subr.bf16.mxu1 %v2114_v42  ;;  %v2092_v42 = vcombine.high %v99_v39, %v103_v40 }
  0xdb   :  { %1009 = vmatpush1.bf16.msra.mxu1 %v2113_v47  ;;  %v115_v47 = vld [vmem:[#allocation5 + $0x98] sm:$0xff] }
  0xdc   :  { %1010 = vmatprep.subr.bf16.mxu1 %v2122_v48  ;;  %v119_v48 = vld [vmem:[#allocation5 + $0xb8] sm:$0xff] }
  0xdd   :  { %v2108_v50 = vcombine.high %v115_v47, %v119_v48 }
  0xdf   :  { %1011 = vmatpush1.bf16.msra.mxu1 %v2121_v53  ;;  %v2107_v53 = vcombine.low %v115_v47, %v119_v48 }
  0xe0   :  { %1012 = vmatprep.subr.bf16.mxu1 %v2130_v54  ;;  %v2116_v54 = vcombine.high %v123_v51, %v127_v52 }
  0xe3   :  { %1013 = vmatpush1.bf16.msra.mxu1 %v2129_v57  ;;  %v2115_v57 = vcombine.low %v123_v51, %v127_v52 }
  0xe4   :  { %1014 = vmatprep.subr.bf16.mxu1 %v2138_v59  ;;  %v139_v59 = vld [vmem:[#allocation5 + $0x158] sm:$0xff] }
  0xe5   :  { %v2131_v0 = vcombine.low %v139_v59, %v143_v60 }
  0xe7   :  { %1015 = vmatpush1.bf16.msra.mxu1 %v2137_v63  ;;  %v151_v63 = vld [vmem:[#allocation5 + $0x1b8] sm:$0xff] }
  0xe8   :  { %1016 = vmatprep.subr.bf16.mxu1 %v2146_v1  ;;  %v2140_v1 = vcombine.high %v147_v62, %v151_v63  ;;  %v2139_v4 = vcombine.low %v147_v62, %v151_v63  ;;  %v2418_v62 = vld [vmem:[#allocation8 + $0x110] ss:$8 sps:$4 sm:$0xff]   ;;  %v2423_v63 = vld [vmem:[#allocation8 + $0x124] ss:$8 sps:$4 sm:$0xff]  }
  0xeb   :  { %1017 = vmatpush1.bf16.msra.mxu1 %v2145_v6  ;;  %v2148_v6 = vcombine.high %v155_v2, %v159_v3  ;;  %v2424_v2 = vld [vmem:[#allocation8 + $0x130] ss:$8 sps:$4 sm:$0xff]   ;;  %v2429_v3 = vld [vmem:[#allocation8 + $0x144] ss:$8 sps:$4 sm:$0xff]  }
  0xec   :  { %1018 = vmatprep.subr.bf16.mxu1 %v2154_v8  ;;  %v167_v8 = vld [vmem:[#allocation5 + $0x238] sm:$0xff] }
  0xed   :  { %v2156_v10 = vcombine.high %v163_v7, %v167_v8 }
  0xef   :  { %1019 = vmatpush1.bf16.msra.mxu1 %v2153_v12  ;;  %v175_v12 = vld [vmem:[#allocation5 + $0x278] sm:$0xff] }
  0xf0   :  { %1020 = vmatprep.subr.bf16.mxu1 %v2162_v13  ;;  %v2155_v13 = vcombine.low %v163_v7, %v167_v8  ;;  %v2164_v14 = vcombine.high %v171_v11, %v175_v12  ;;  %v2430_v7 = vld [vmem:[#allocation8 + $0x150] ss:$8 sps:$4 sm:$0xff]   ;;  %v2435_v8 = vld [vmem:[#allocation8 + $0x164] ss:$8 sps:$4 sm:$0xff]  }
  0xf3   :  { %1021 = vmatpush1.bf16.msra.mxu1 %v2161_v16  ;;  %v183_v16 = vld [vmem:[#allocation5 + $0x2b8] sm:$0xff] }
  0xf4   :  { %1022 = vmatprep.subr.bf16.mxu1 %v2170_v18  ;;  %v2163_v18 = vcombine.low %v171_v11, %v175_v12  ;;  %v2172_v19 = vcombine.high %v179_v15, %v183_v16  ;;  %v2436_v11 = vld [vmem:[#allocation8 + $0x170] ss:$8 sps:$4 sm:$0xff]   ;;  %v2441_v12 = vld [vmem:[#allocation8 + $0x184] ss:$8 sps:$4 sm:$0xff]  }
  0xf7   :  { %1023 = vmatpush1.bf16.msra.mxu1 %v2169_v21  ;;  %v191_v21 = vld [vmem:[#allocation5 + $0x2f8] sm:$0xff] }
  0xf8   :  { %1024 = vmatprep.subr.bf16.mxu1 %v2178_v22  ;;  %v2171_v22 = vcombine.low %v179_v15, %v183_v16  ;;  %v2180_v23 = vcombine.high %v187_v20, %v191_v21  ;;  %v2442_v15 = vld [vmem:[#allocation8 + $0x190] ss:$8 sps:$4 sm:$0xff]   ;;  %v2447_v16 = vld [vmem:[#allocation8 + $0x1a4] ss:$8 sps:$4 sm:$0xff]  }
  0xfb   :  { %1025 = vmatpush1.bf16.msra.mxu1 %v2177_v25  ;;  %v199_v25 = vld [vmem:[#allocation5 + $0x338] sm:$0xff] }
  0xfc   :  { %1026 = vmatprep.subr.bf16.mxu1 %v2186_v26  ;;  %v2179_v26 = vcombine.low %v187_v20, %v191_v21  ;;  %v2188_v27 = vcombine.high %v195_v24, %v199_v25  ;;  %v2448_v20 = vld [vmem:[#allocation8 + $0x1b0] ss:$8 sps:$4 sm:$0xff]   ;;  %v2453_v21 = vld [vmem:[#allocation8 + $0x1c4] ss:$8 sps:$4 sm:$0xff]  }
  0xff   :  { %1027 = vmatpush1.bf16.msra.mxu1 %v2185_v29  ;;  %v207_v29 = vld [vmem:[#allocation5 + $0x378] sm:$0xff] }
 0x100   :  { %1028 = vmatprep.subr.bf16.mxu1 %v2194_v30  ;;  %v2187_v30 = vcombine.low %v195_v24, %v199_v25  ;;  %v2196_v31 = vcombine.high %v203_v28, %v207_v29 }
 0x103   :  { %1029 = vmatpush1.bf16.msra.mxu1 %v2193_v33  ;;  %v215_v33 = vld [vmem:[#allocation5 + $0x3b8] sm:$0xff] }
 0x104   :  { %1030 = vmatprep.subr.bf16.mxu1 %v2202_v34  ;;  %v2195_v34 = vcombine.low %v203_v28, %v207_v29  ;;  %v2204_v35 = vcombine.high %v211_v32, %v215_v33  ;;  %v2459_v28 = vld [vmem:[#allocation8 + $0x1e4] ss:$8 sps:$4 sm:$0xff]  }
 0x107   :  { %1031 = vmatpush1.bf16.msra.mxu1 %v2201_v37  ;;  %v223_v37 = vld [vmem:[#allocation5 + $0x3f8] sm:$0xff] }
 0x108   :  { %1032 = vmatprep.subr.bf16.mxu1 %v2210_v38  ;;  %v2203_v38 = vcombine.low %v211_v32, %v215_v33  ;;  %v2212_v39 = vcombine.high %v219_v36, %v223_v37  ;;  %v2211_v40 = vcombine.low %v219_v36, %v223_v37 }
 0x10b   :  { %1033 = vmatpush1.bf16.msra.mxu1 %v2209_v41  ;;  %v80_v41 = vlaneseq }
 0x10c   :  { %1045 = vmatprep.subr.bf16.mxu1 %v2092_v42 }
 0x10d   :  { %v2791_v42 = vshrl.u32 %v80_v41, 7  ;;  %v2460_v41 = vld [vmem:[#allocation8 + $0x1f0] ss:$8 sps:$4 sm:$0xff]  }
 0x10e   :  { %1035 = vmatmul.mubr.bf16.vlgmr.msra.gmra.mrb[8].mxu1 %v2782_v5 }
 0x10f   :  { %1046 = vmatpush1.bf16.msra.mxu1 %v2091_v45  ;;  %1077 = vmatprep.mubr.bf16.mxu1 %v2779_v17  ;;  %v2132_v17 = vcombine.high %v139_v59, %v143_v60  ;;  %v82_v43 = vsub.s32 0, %v2791_v42  ;;  %v86_v45 = vsub.s32 1, %v2791_v42  ;;  %v236_v24 = vsub.s32 2, %v2791_v42 }
 0x110   :  { %1047 = vmatprep.subr.bf16.mxu1 %v2100_v46  ;;  %v240_v25 = vsub.s32 3, %v2791_v42 }
 0x111   :  { %v229_v46 = vrot.slane %v2794_v44, %v82_v43  ;;  %v233_v47 = vrot.slane %v2794_v44, %v86_v45 }
 0x112   :  { %v241_v29 = vrot.slane %v2794_v44, %v240_v25 }
 0x113   :  { %1048 = vmatpush1.bf16.msra.mxu1 %v2099_v49 }
 0x114   :  { %1049 = vmatprep.subr.bf16.mxu1 %v2108_v50 }
 0x117   :  { %1050 = vmatpush1.bf16.msra.mxu1 %v2107_v53 }
 0x118   :  { %1051 = vmatprep.subr.bf16.mxu1 %v2116_v54 }
 0x11b   :  { %1052 = vmatpush1.bf16.msra.mxu1 %v2115_v57 }
 0x11c   :  { %1053 = vmatprep.subr.bf16.mxu1 %v2124_v58 }
 0x11f   :  { %1054 = vmatpush1.bf16.msra.mxu1 %v2123_v61  ;;  %v2415_v61 = vld [vmem:[#allocation8 + $0x100] ss:$8 sps:$4 sm:$0xff]  }
 0x120   :  { %1055 = vmatprep.subr.bf16.mxu1 %v2132_v17  ;;  %v2420_v17 = vld [vmem:[#allocation8 + $0x114] ss:$8 sps:$4 sm:$0xff]  }
 0x123   :  { %1056 = vmatpush1.bf16.msra.mxu1 %v2131_v0  ;;  %v2421_v0 = vld [vmem:[#allocation8 + $0x120] ss:$8 sps:$4 sm:$0xff]  }
 0x124   :  { %1057 = vmatprep.subr.bf16.mxu1 %v2140_v1  ;;  %v2426_v1 = vld [vmem:[#allocation8 + $0x134] ss:$8 sps:$4 sm:$0xff]  }
 0x127   :  { %1058 = vmatpush1.bf16.msra.mxu1 %v2139_v4  ;;  %v2427_v4 = vld [vmem:[#allocation8 + $0x140] ss:$8 sps:$4 sm:$0xff]  }
 0x128   :  { %1059 = vmatprep.subr.bf16.mxu1 %v2148_v6  ;;  %v2432_v6 = vld [vmem:[#allocation8 + $0x154] ss:$8 sps:$4 sm:$0xff]  }
 0x12b   :  { %1060 = vmatpush1.bf16.msra.mxu1 %v2147_v9  ;;  %v2433_v9 = vld [vmem:[#allocation8 + $0x160] ss:$8 sps:$4 sm:$0xff]  }
 0x12c   :  { %1061 = vmatprep.subr.bf16.mxu1 %v2156_v10  ;;  %v2438_v10 = vld [vmem:[#allocation8 + $0x174] ss:$8 sps:$4 sm:$0xff]  }
 0x12f   :  { %1062 = vmatpush1.bf16.msra.mxu1 %v2155_v13  ;;  %v2439_v13 = vld [vmem:[#allocation8 + $0x180] ss:$8 sps:$4 sm:$0xff]  }
 0x130   :  { %1063 = vmatprep.subr.bf16.mxu1 %v2164_v14  ;;  %v2444_v14 = vld [vmem:[#allocation8 + $0x194] ss:$8 sps:$4 sm:$0xff]  }
 0x133   :  { %1064 = vmatpush1.bf16.msra.mxu1 %v2163_v18  ;;  %v2445_v18 = vld [vmem:[#allocation8 + $0x1a0] ss:$8 sps:$4 sm:$0xff]  }
 0x134   :  { %1065 = vmatprep.subr.bf16.mxu1 %v2172_v19  ;;  %v2450_v19 = vld [vmem:[#allocation8 + $0x1b4] ss:$8 sps:$4 sm:$0xff]  }
 0x137   :  { %1066 = vmatpush1.bf16.msra.mxu1 %v2171_v22  ;;  %v2451_v22 = vld [vmem:[#allocation8 + $0x1c0] ss:$8 sps:$4 sm:$0xff]  }
 0x138   :  { %1067 = vmatprep.subr.bf16.mxu1 %v2180_v23  ;;  %v2456_v23 = vld [vmem:[#allocation8 + $0x1d4] ss:$8 sps:$4 sm:$0xff]  }
 0x13b   :  { %1068 = vmatpush1.bf16.msra.mxu1 %v2179_v26  ;;  %v2454_v26 = vld [vmem:[#allocation8 + $0x1d0] ss:$8 sps:$4 sm:$0xff]  }
 0x13c   :  { %1069 = vmatprep.subr.bf16.mxu1 %v2188_v27  ;;  %v237_v27 = vrot.slane %v2794_v44, %v236_v24  ;;  %v2510_v24 = vld [vmem:[#allocation8 + $0x2f4] ss:$8 sps:$4 sm:$0xff]  }
 0x13f   :  { %1070 = vmatpush1.bf16.msra.mxu1 %v2187_v30 }
 0x140   :  { %1071 = vmatprep.subr.bf16.mxu1 %v2196_v31  ;;  %v2457_v31 = vld [vmem:[#allocation8 + $0x1e0] ss:$8 sps:$4 sm:$0xff]  }
 0x143   :  { %1072 = vmatpush1.bf16.msra.mxu1 %v2195_v34  ;;  %v2462_v34 = vld [vmem:[#allocation8 + $0x1f4] ss:$8 sps:$4 sm:$0xff]  }
 0x144   :  { %1073 = vmatprep.subr.bf16.mxu1 %v2204_v35 }
 0x147   :  { %1074 = vmatpush1.bf16.msra.mxu1 %v2203_v38 }
 0x148   :  { %1075 = vmatprep.subr.bf16.mxu1 %v2212_v39 }
 0x14b   :  { %1076 = vmatpush1.bf16.msra.mxu1 %v2211_v40 }
 0x14e   :  { %1078 = vmatmul.mubr.bf16.vlgmr.msra.gmra.mrb[12].mxu1 %v2782_v5 }
 0x161   :  { %v950_v48 = vpop.f32.mrb[0].mxu1 }
 0x162   :  { %v951_v49 = vadd.f32 %v950_v48, %v229_v46  ;;  %v952_v5 = vpop.f32.mrb[1].mxu1 }
 0x163   :  { %v953_v50 = vadd.f32 %v952_v5, %v233_v47  ;;  %v954_v51 = vpop.f32.mrb[2].mxu1 }
 0x164   :  { %v1088_v52 = vmax.f32 %v951_v49, 0.0  ;;  %v955_v53 = vadd.f32 %v954_v51, %v229_v46  ;;  %v956_v54 = vpop.f32.mrb[3].mxu1  ;;  %v2463_v51 = vld [vmem:[#allocation8 + $0x200] ss:$8 sps:$4 sm:$0xff]  }
 0x165   :  { %v957_v55 = vadd.f32 %v956_v54, %v233_v47  ;;  %v1089_v57 = vmax.f32 %v953_v50, 0.0  ;;  %v2465_v47 = vld [vmem:[#allocation8 + $0x204] ss:$8 sps:$4 sm:$0xff]  }
 0x166   :  { %v1096_v56 = vmax.f32 %v955_v53, 0.0  ;;  %v2466_v53 = vld [vmem:[#allocation8 + $0x210] ss:$8 sps:$4 sm:$0xff]   ;;  %v2471_v54 = vld [vmem:[#allocation8 + $0x224] ss:$8 sps:$4 sm:$0xff]  }
 0x167   :  { %v1097_v58 = vmax.f32 %v957_v55, 0.0  ;;  %v2469_v55 = vld [vmem:[#allocation8 + $0x220] ss:$8 sps:$4 sm:$0xff]  }
 0x168   :  { %v1108_v59 = vpack.c.bf16 %v1096_v56, %v1088_v52  ;;  %v2468_v52 = vld [vmem:[#allocation8 + $0x214] ss:$8 sps:$4 sm:$0xff]  }
 0x169   :  { %v1109_v60 = vpack.c.bf16 %v1097_v58, %v1089_v57  ;;  %v2474_v56 = vld [vmem:[#allocation8 + $0x234] ss:$8 sps:$4 sm:$0xff]   ;;  %v2472_v57 = vld [vmem:[#allocation8 + $0x230] ss:$8 sps:$4 sm:$0xff]   ;;  %v2477_v58 = vld [vmem:[#allocation8 + $0x244] ss:$8 sps:$4 sm:$0xff]  }
 0x16b   :  { %1916 = vmatprep.mubr.bf16.mxu0 %v1109_v60  ;;  %v2480_v60 = vld [vmem:[#allocation8 + $0x254] ss:$8 sps:$4 sm:$0xff]  }
 0x16c   :  { %1917 = vmatmul.mubr.bf16.vlgmr.msra.gmra.mrb[0].mxu0 %v1108_v59  ;;  %v2475_v59 = vld [vmem:[#allocation8 + $0x240] ss:$8 sps:$4 sm:$0xff]  }
 0x16d   :  { %1928 = vmatpush1.bf16.msra.mxu0 %v2415_v61  ;;  %v2478_v61 = vld [vmem:[#allocation8 + $0x250] ss:$8 sps:$4 sm:$0xff]  }
 0x16e   :  { %1929 = vmatprep.subr.bf16.mxu0 %v2420_v17  ;;  %v2483_v17 = vld [vmem:[#allocation8 + $0x264] ss:$8 sps:$4 sm:$0xff]  }
 0x171   :  { %1930 = vmatpush1.bf16.msra.mxu0 %v2418_v62  ;;  %v2481_v62 = vld [vmem:[#allocation8 + $0x260] ss:$8 sps:$4 sm:$0xff]  }
 0x172   :  { %1931 = vmatprep.subr.bf16.mxu0 %v2423_v63  ;;  %v2486_v63 = vld [vmem:[#allocation8 + $0x274] ss:$8 sps:$4 sm:$0xff]  }
 0x175   :  { %1932 = vmatpush1.bf16.msra.mxu0 %v2421_v0  ;;  %v2484_v0 = vld [vmem:[#allocation8 + $0x270] ss:$8 sps:$4 sm:$0xff]  }
 0x176   :  { %1933 = vmatprep.subr.bf16.mxu0 %v2426_v1  ;;  %v2489_v1 = vld [vmem:[#allocation8 + $0x284] ss:$8 sps:$4 sm:$0xff]  }
 0x179   :  { %1934 = vmatpush1.bf16.msra.mxu0 %v2424_v2  ;;  %v2487_v2 = vld [vmem:[#allocation8 + $0x280] ss:$8 sps:$4 sm:$0xff]  }
 0x17a   :  { %1935 = vmatprep.subr.bf16.mxu0 %v2429_v3  ;;  %v2492_v3 = vld [vmem:[#allocation8 + $0x294] ss:$8 sps:$4 sm:$0xff]  }
 0x17d   :  { %1936 = vmatpush1.bf16.msra.mxu0 %v2427_v4  ;;  %v2490_v4 = vld [vmem:[#allocation8 + $0x290] ss:$8 sps:$4 sm:$0xff]  }
 0x17e   :  { %1937 = vmatprep.subr.bf16.mxu0 %v2432_v6  ;;  %v2495_v6 = vld [vmem:[#allocation8 + $0x2a4] ss:$8 sps:$4 sm:$0xff]  }
 0x181   :  { %1938 = vmatpush1.bf16.msra.mxu0 %v2430_v7  ;;  %v2493_v7 = vld [vmem:[#allocation8 + $0x2a0] ss:$8 sps:$4 sm:$0xff]  }
 0x182   :  { %1939 = vmatprep.subr.bf16.mxu0 %v2435_v8  ;;  %v2498_v8 = vld [vmem:[#allocation8 + $0x2b4] ss:$8 sps:$4 sm:$0xff]  }
 0x185   :  { %1940 = vmatpush1.bf16.msra.mxu0 %v2433_v9  ;;  %v2496_v9 = vld [vmem:[#allocation8 + $0x2b0] ss:$8 sps:$4 sm:$0xff]  }
 0x186   :  { %1941 = vmatprep.subr.bf16.mxu0 %v2438_v10  ;;  %v2501_v10 = vld [vmem:[#allocation8 + $0x2c4] ss:$8 sps:$4 sm:$0xff]  }
 0x189   :  { %1942 = vmatpush1.bf16.msra.mxu0 %v2436_v11  ;;  %v2499_v11 = vld [vmem:[#allocation8 + $0x2c0] ss:$8 sps:$4 sm:$0xff]  }
 0x18a   :  { %1943 = vmatprep.subr.bf16.mxu0 %v2441_v12  ;;  %v2504_v12 = vld [vmem:[#allocation8 + $0x2d4] ss:$8 sps:$4 sm:$0xff]  }
 0x18d   :  { %1944 = vmatpush1.bf16.msra.mxu0 %v2439_v13  ;;  %v244_v13 = vsub.s32 4, %v2791_v42 }
 0x18e   :  { %1945 = vmatprep.subr.bf16.mxu0 %v2444_v14  ;;  %v248_v14 = vsub.s32 5, %v2791_v42 }
 0x191   :  { %1946 = vmatpush1.bf16.msra.mxu0 %v2442_v15  ;;  %v2502_v15 = vld [vmem:[#allocation8 + $0x2d0] ss:$8 sps:$4 sm:$0xff]  }
 0x192   :  { %1947 = vmatprep.subr.bf16.mxu0 %v2447_v16  ;;  %v245_v16 = vrot.slane %v2794_v44, %v244_v13  ;;  %v2558_v13 = vld [vmem:[#allocation8 + $0x3f4] ss:$8 sps:$4 sm:$0xff]  }
 0x195   :  { %1948 = vmatpush1.bf16.msra.mxu0 %v2445_v18  ;;  %v2507_v18 = vld [vmem:[#allocation8 + $0x2e4] ss:$8 sps:$4 sm:$0xff]  }
 0x196   :  { %1949 = vmatprep.subr.bf16.mxu0 %v2450_v19  ;;  %v249_v19 = vrot.slane %v2794_v44, %v248_v14 }
 0x199   :  { %1950 = vmatpush1.bf16.msra.mxu0 %v2448_v20 }
 0x19a   :  { %1951 = vmatprep.subr.bf16.mxu0 %v2453_v21  ;;  %v2505_v21 = vld [vmem:[#allocation8 + $0x2e0] ss:$8 sps:$4 sm:$0xff]  }
 0x19d   :  { %1952 = vmatpush1.bf16.msra.mxu0 %v2451_v22 }
 0x19e   :  { %1953 = vmatprep.subr.bf16.mxu0 %v2456_v23 }
 0x1a1   :  { %v993_v30 = vpop.f32.mrb[4].mxu1  ;;  %1954 = vmatpush1.bf16.msra.mxu0 %v2454_v26 }
 0x1a2   :  { %v994_v32 = vadd.f32 %v993_v30, %v237_v27  ;;  %v995_v33 = vpop.f32.mrb[5].mxu1  ;;  %1955 = vmatprep.subr.bf16.mxu0 %v2459_v28 }
 0x1a3   :  { %v996_v35 = vadd.f32 %v995_v33, %v241_v29  ;;  %v997_v36 = vpop.f32.mrb[6].mxu1  ;;  %v2513_v33 = vld [vmem:[#allocation8 + $0x304] ss:$8 sps:$4 sm:$0xff]  }
 0x1a4   :  { %v1090_v37 = vmax.f32 %v994_v32, 0.0  ;;  %v998_v38 = vadd.f32 %v997_v36, %v237_v27  ;;  %v999_v39 = vpop.f32.mrb[7].mxu1 }
 0x1a5   :  { %v1000_v40 = vadd.f32 %v999_v39, %v241_v29  ;;  %1956 = vmatpush1.bf16.msra.mxu0 %v2457_v31  ;;  %v1091_v48 = vmax.f32 %v996_v35, 0.0  ;;  %v2508_v31 = vld [vmem:[#allocation8 + $0x2f0] ss:$8 sps:$4 sm:$0xff]   ;;  %v2516_v39 = vld [vmem:[#allocation8 + $0x314] ss:$8 sps:$4 sm:$0xff]  }
 0x1a6   :  { %v1098_v46 = vmax.f32 %v998_v38, 0.0  ;;  %1957 = vmatprep.subr.bf16.mxu0 %v2462_v34  ;;  %v2511_v38 = vld [vmem:[#allocation8 + $0x300] ss:$8 sps:$4 sm:$0xff]  }
 0x1a7   :  { %v1099_v49 = vmax.f32 %v1000_v40, 0.0  ;;  %v2514_v40 = vld [vmem:[#allocation8 + $0x310] ss:$8 sps:$4 sm:$0xff]  }
 0x1a8   :  { %v1110_v5 = vpack.c.bf16 %v1098_v46, %v1090_v37  ;;  %v2517_v46 = vld [vmem:[#allocation8 + $0x320] ss:$8 sps:$4 sm:$0xff]  }
 0x1a9   :  { %v1111_v50 = vpack.c.bf16 %v1099_v49, %v1091_v48  ;;  %1958 = vmatpush1.bf16.msra.mxu0 %v2460_v41  ;;  %v2519_v41 = vld [vmem:[#allocation8 + $0x324] ss:$8 sps:$4 sm:$0xff]   ;;  %v2520_v48 = vld [vmem:[#allocation8 + $0x330] ss:$8 sps:$4 sm:$0xff]  }
 0x1aa   :  { %1970 = vmatprep.subr.bf16.mxu0 %v2465_v47  ;;  %v2522_v47 = vld [vmem:[#allocation8 + $0x334] ss:$8 sps:$4 sm:$0xff]   ;;  %v2525_v49 = vld [vmem:[#allocation8 + $0x344] ss:$8 sps:$4 sm:$0xff]  }
 0x1ab   :  { %1959 = vmatprep.mubr.bf16.mxu0 %v1111_v50  ;;  %v2528_v50 = vld [vmem:[#allocation8 + $0x354] ss:$8 sps:$4 sm:$0xff]  }
 0x1ac   :  { %1960 = vmatmul.mubr.bf16.vlgmr.msra.gmra.mrb[0].mxu0 %v1110_v5  ;;  %v2523_v5 = vld [vmem:[#allocation8 + $0x340] ss:$8 sps:$4 sm:$0xff]  }
 0x1ad   :  { %1971 = vmatpush1.bf16.msra.mxu0 %v2463_v51  ;;  %v2526_v51 = vld [vmem:[#allocation8 + $0x350] ss:$8 sps:$4 sm:$0xff]  }
 0x1ae   :  { %1972 = vmatprep.subr.bf16.mxu0 %v2468_v52  ;;  %v2531_v52 = vld [vmem:[#allocation8 + $0x364] ss:$8 sps:$4 sm:$0xff]  }
 0x1b1   :  { %1973 = vmatpush1.bf16.msra.mxu0 %v2466_v53  ;;  %v2529_v53 = vld [vmem:[#allocation8 + $0x360] ss:$8 sps:$4 sm:$0xff]  }
 0x1b2   :  { %1974 = vmatprep.subr.bf16.mxu0 %v2471_v54  ;;  %v2534_v54 = vld [vmem:[#allocation8 + $0x374] ss:$8 sps:$4 sm:$0xff]  }
 0x1b5   :  { %1975 = vmatpush1.bf16.msra.mxu0 %v2469_v55  ;;  %v2532_v55 = vld [vmem:[#allocation8 + $0x370] ss:$8 sps:$4 sm:$0xff]  }
 0x1b6   :  { %1976 = vmatprep.subr.bf16.mxu0 %v2474_v56  ;;  %v2537_v56 = vld [vmem:[#allocation8 + $0x384] ss:$8 sps:$4 sm:$0xff]  }
 0x1b9   :  { %1977 = vmatpush1.bf16.msra.mxu0 %v2472_v57  ;;  %v2535_v57 = vld [vmem:[#allocation8 + $0x380] ss:$8 sps:$4 sm:$0xff]  }
 0x1ba   :  { %1978 = vmatprep.subr.bf16.mxu0 %v2477_v58  ;;  %v2540_v58 = vld [vmem:[#allocation8 + $0x394] ss:$8 sps:$4 sm:$0xff]  }
 0x1bd   :  { %1979 = vmatpush1.bf16.msra.mxu0 %v2475_v59  ;;  %v2538_v59 = vld [vmem:[#allocation8 + $0x390] ss:$8 sps:$4 sm:$0xff]  }
 0x1be   :  { %1980 = vmatprep.subr.bf16.mxu0 %v2480_v60  ;;  %v2543_v60 = vld [vmem:[#allocation8 + $0x3a4] ss:$8 sps:$4 sm:$0xff]  }
 0x1c1   :  { %1981 = vmatpush1.bf16.msra.mxu0 %v2478_v61  ;;  %v2541_v61 = vld [vmem:[#allocation8 + $0x3a0] ss:$8 sps:$4 sm:$0xff]  }
 0x1c2   :  { %1982 = vmatprep.subr.bf16.mxu0 %v2483_v17  ;;  %v2546_v17 = vld [vmem:[#allocation8 + $0x3b4] ss:$8 sps:$4 sm:$0xff]  }
 0x1c5   :  { %1983 = vmatpush1.bf16.msra.mxu0 %v2481_v62  ;;  %v2544_v62 = vld [vmem:[#allocation8 + $0x3b0] ss:$8 sps:$4 sm:$0xff]  }
 0x1c6   :  { %1984 = vmatprep.subr.bf16.mxu0 %v2486_v63  ;;  %v2549_v63 = vld [vmem:[#allocation8 + $0x3c4] ss:$8 sps:$4 sm:$0xff]  }
 0x1c9   :  { %1985 = vmatpush1.bf16.msra.mxu0 %v2484_v0  ;;  %v2547_v0 = vld [vmem:[#allocation8 + $0x3c0] ss:$8 sps:$4 sm:$0xff]  }
 0x1ca   :  { %1986 = vmatprep.subr.bf16.mxu0 %v2489_v1  ;;  %v2552_v1 = vld [vmem:[#allocation8 + $0x3d4] ss:$8 sps:$4 sm:$0xff]  }
 0x1cd   :  { %1987 = vmatpush1.bf16.msra.mxu0 %v2487_v2  ;;  %v252_v2 = vsub.s32 6, %v2791_v42 }
 0x1ce   :  { %1988 = vmatprep.subr.bf16.mxu0 %v2492_v3  ;;  %v256_v3 = vsub.s32 7, %v2791_v42 }
 0x1d1   :  { %1989 = vmatpush1.bf16.msra.mxu0 %v2490_v4  ;;  %v2550_v4 = vld [vmem:[#allocation8 + $0x3d0] ss:$8 sps:$4 sm:$0xff]  }
 0x1d2   :  { %1990 = vmatprep.subr.bf16.mxu0 %v2495_v6  ;;  %v253_v6 = vrot.slane %v2794_v44, %v252_v2 }
 0x1d5   :  { %1991 = vmatpush1.bf16.msra.mxu0 %v2493_v7  ;;  %v2555_v7 = vld [vmem:[#allocation8 + $0x3e4] ss:$8 sps:$4 sm:$0xff]  }
 0x1d6   :  { %1992 = vmatprep.subr.bf16.mxu0 %v2498_v8  ;;  %v257_v8 = vrot.slane %v2794_v44, %v256_v3 }
 0x1d9   :  { %1993 = vmatpush1.bf16.msra.mxu0 %v2496_v9 }
 0x1da   :  { %1994 = vmatprep.subr.bf16.mxu0 %v2501_v10  ;;  %v2553_v10 = vld [vmem:[#allocation8 + $0x3e0] ss:$8 sps:$4 sm:$0xff]  }
 0x1dd   :  { %1995 = vmatpush1.bf16.msra.mxu0 %v2499_v11 }
 0x1de   :  { %1996 = vmatprep.subr.bf16.mxu0 %v2504_v12 }
 0x1e1   :  { %v1036_v20 = vpop.f32.mrb[8].mxu1  ;;  %1997 = vmatpush1.bf16.msra.mxu0 %v2502_v15 }
 0x1e2   :  { %v1037_v22 = vadd.f32 %v1036_v20, %v245_v16  ;;  %v1038_v23 = vpop.f32.mrb[9].mxu1  ;;  %1998 = vmatprep.subr.bf16.mxu0 %v2507_v18  ;;  %v2556_v20 = vld [vmem:[#allocation8 + $0x3f0] ss:$8 sps:$4 sm:$0xff]  }
 0x1e3   :  { %v1039_v25 = vadd.f32 %v1038_v23, %v249_v19  ;;  %v1040_v26 = vpop.f32.mrb[10].mxu1 }
 0x1e4   :  { %v1092_v27 = vmax.f32 %v1037_v22, 0.0  ;;  %v1041_v28 = vadd.f32 %v1040_v26, %v245_v16  ;;  %v1042_v29 = vpop.f32.mrb[11].mxu1  ;;  %v78_v26 = vld [vmem:[%s2838_s4] sm:$0x3]  ;;  %s2647_s4 = scalar_lea.vmem %s2070_s18, 512 }
 0x1e5   :  { %v1043_v30 = vadd.f32 %v1042_v29, %v249_v19  ;;  %1999 = vmatpush1.bf16.msra.mxu0 %v2505_v21  ;;  %v1093_v34 = vmax.f32 %v1039_v25, 0.0  ;;  %p2648_p4 = scmp.ne.s32.totalorder %s2070_s18, %s2647_s4  ;;  %p2653_p6 = scmp.lt.s32.totalorder %s2647_s4, %s2647_s4 }
 0x1e6   :  { %v1100_v32 = vmax.f32 %v1041_v28, 0.0  ;;  %2000 = vmatprep.subr.bf16.mxu0 %v2510_v24  ;;  %v87_v28 = vrot.slane %v78_v26, %v86_v45 }
 0x1e7   :  { %v1101_v35 = vmax.f32 %v1043_v30, 0.0  ;;  %p2654_p7 = por %p2653_p6, %p2652_p5 }
 0x1e8   :  { %v1112_v36 = vpack.c.bf16 %v1100_v32, %v1092_v27  ;;  %v83_v27 = vrot.slane %v78_v26, %v82_v43 }
 0x1e9   :  { %v1113_v37 = vpack.c.bf16 %v1101_v35, %v1093_v34  ;;  %2001 = vmatpush1.bf16.msra.mxu0 %v2508_v31  ;;  %p2655_p8 = pnand %p2654_p7, %p2648_p4 }
 0x1ea   :  { %2013 = vmatprep.subr.bf16.mxu0 %v2513_v33 }
 0x1eb   :  { %2002 = vmatprep.mubr.bf16.mxu0 %v1113_v37 }
 0x1ec   :  { %2003 = vmatmul.mubr.bf16.vlgmr.msra.gmra.mrb[0].mxu0 %v1112_v36 }
 0x1ed   :  { %2014 = vmatpush1.bf16.msra.mxu0 %v2511_v38 }
 0x1ee   :  { %2015 = vmatprep.subr.bf16.mxu0 %v2516_v39 }
 0x1f1   :  { %2016 = vmatpush1.bf16.msra.mxu0 %v2514_v40 }
 0x1f2   :  { %2017 = vmatprep.subr.bf16.mxu0 %v2519_v41 }
 0x1f5   :  { %2018 = vmatpush1.bf16.msra.mxu0 %v2517_v46 }
 0x1f6   :  { %2019 = vmatprep.subr.bf16.mxu0 %v2522_v47 }
 0x1f9   :  { %2020 = vmatpush1.bf16.msra.mxu0 %v2520_v48 }
 0x1fa   :  { %2021 = vmatprep.subr.bf16.mxu0 %v2525_v49 }
 0x1fd   :  { %2022 = vmatpush1.bf16.msra.mxu0 %v2523_v5 }
 0x1fe   :  { %2023 = vmatprep.subr.bf16.mxu0 %v2528_v50 }
 0x201   :  { %2024 = vmatpush1.bf16.msra.mxu0 %v2526_v51 }
 0x202   :  { %2025 = vmatprep.subr.bf16.mxu0 %v2531_v52 }
 0x205   :  { %2026 = vmatpush1.bf16.msra.mxu0 %v2529_v53 }
 0x206   :  { %2027 = vmatprep.subr.bf16.mxu0 %v2534_v54 }
 0x209   :  { %2028 = vmatpush1.bf16.msra.mxu0 %v2532_v55 }
 0x20a   :  { %2029 = vmatprep.subr.bf16.mxu0 %v2537_v56 }
 0x20d   :  { %2030 = vmatpush1.bf16.msra.mxu0 %v2535_v57 }
 0x20e   :  { %2031 = vmatprep.subr.bf16.mxu0 %v2540_v58 }
 0x211   :  { %2032 = vmatpush1.bf16.msra.mxu0 %v2538_v59 }
 0x212   :  { %2033 = vmatprep.subr.bf16.mxu0 %v2543_v60 }
 0x215   :  { %2034 = vmatpush1.bf16.msra.mxu0 %v2541_v61 }
 0x216   :  { %2035 = vmatprep.subr.bf16.mxu0 %v2546_v17 }
 0x219   :  { %2036 = vmatpush1.bf16.msra.mxu0 %v2544_v62 }
 0x21a   :  { %2037 = vmatprep.subr.bf16.mxu0 %v2549_v63 }
 0x21d   :  { %2038 = vmatpush1.bf16.msra.mxu0 %v2547_v0 }
 0x21e   :  { %2039 = vmatprep.subr.bf16.mxu0 %v2552_v1 }
 0x221   :  { %v1079_v9 = vpop.f32.mrb[12].mxu1  ;;  %2040 = vmatpush1.bf16.msra.mxu0 %v2550_v4 }
 0x222   :  { %v1080_v11 = vadd.f32 %v1079_v9, %v253_v6  ;;  %v1081_v12 = vpop.f32.mrb[13].mxu1  ;;  %2041 = vmatprep.subr.bf16.mxu0 %v2555_v7 }
 0x223   :  { %v1082_v14 = vadd.f32 %v1081_v12, %v257_v8  ;;  %v1083_v15 = vpop.f32.mrb[14].mxu1 }
 0x224   :  { %v1084_v16 = vadd.f32 %v1083_v15, %v253_v6  ;;  %v1085_v18 = vpop.f32.mrb[15].mxu1  ;;  %v1094_v21 = vmax.f32 %v1080_v11, 0.0 }
 0x225   :  { %v1086_v19 = vadd.f32 %v1085_v18, %v257_v8  ;;  %2042 = vmatpush1.bf16.msra.mxu0 %v2553_v10  ;;  %v1095_v23 = vmax.f32 %v1082_v14, 0.0 }
 0x226   :  { %v1102_v22 = vmax.f32 %v1084_v16, 0.0  ;;  %2043 = vmatprep.subr.bf16.mxu0 %v2558_v13 }
 0x227   :  { %v1103_v24 = vmax.f32 %v1086_v19, 0.0 }
 0x228   :  { %v1114_v44 = vpack.c.bf16 %v1102_v22, %v1094_v21 }
 0x229   :  { %v1115_v25 = vpack.c.bf16 %v1103_v24, %v1095_v23  ;;  %2044 = vmatpush1.bf16.msra.mxu0 %v2556_v20 }
 0x22b   :  { %2045 = vmatprep.mubr.bf16.mxu0 %v1115_v25 }
 0x22c   :  { %2046 = vmatmul.mubr.bf16.vlgmr.msra.gmra.mrb[0].mxu0 %v1114_v44 }
 0x2ff   :  { %v2047_v29 = vpop.f32.mrb[0].mxu0 }
 0x300   :  { %v2056_v30 = vadd.f32 %v2047_v29, %v83_v27  ;;  %v2049_v31 = vpop.f32.mrb[1].mxu0 }
 0x301   :  { %v2057_v32 = vadd.f32 %v2049_v31, %v87_v28  ;;  %v2051_v33 = vpop.f32.mrb[2].mxu0 }
 0x302   :  { %2060 = vst [vmem:[#allocation10] sm:$0xff] %v2056_v30  ;;  %v2058_v34 = vadd.f32 %v2051_v33, %v83_v27  ;;  %v2053_v35 = vpop.f32.mrb[3].mxu0 }
 0x303   :  { %2061 = vst [vmem:[#allocation10 + $0x8] sm:$0xff] %v2057_v32  ;;  %v2059_v36 = vadd.f32 %v2053_v35, %v87_v28 }
 0x304   :  { %2062 = vst [vmem:[#allocation10 + $0x10] sm:$0xff] %v2058_v34 }
 0x305   :  { %2063 = vst [vmem:[#allocation10 + $0x18] sm:$0xff] %v2059_v36 }
 0x306   :  { %2658 = shalt.err (!%p2655_p8)
}
 0x307   :  { %s2659_s21 = scalar_lea.hbm %s2839_s5, 512 }
 0x308   :  { %p2660_p9 = scmp.ne.s32.totalorder %s2839_s5, %s2659_s21  ;;  %p2663_p10 = scmp.lt.u32.totalorder %s2659_s21, %s2839_s5 }
 0x30a   :  { %p2665_p11 = pnand %p2663_p10, %p2660_p9 }
 0x30c   :  { %2668 = shalt.err (!%p2665_p11)
}
 0x30d   :  { %s2686_s26 = smov 256   ;;  %s2687_s27 = smov 16  }
 0x30e   :  { %2075 = dma.vmem_to_hbm [thread:$0]  %s2070_s18, 512, %s2839_s5, [#allocation4], %s2686_s26, %s2686_s26, %s2687_s27  }
 0x30f   :  { %2675 = dma.done.wait [#allocation4], 512  }
 0x310   :  { %2676 = vsyncadd [#allocation4], 4294966784 }
 0x311   :  { %2079 = vsyncpa [#allocation3], 1 }
 0x312   :  { %2080 = vsyncpa [#allocation6], 1 }
 0x313   :  { %2081 = vsyncpa [#allocation9], 1 }
 0x314   :  { %2082 = vsyncpa [#allocation4], 1 }

</bundles_post_ra>
